<compile_context>
chip_gen: v7x
topology: tpu7x:2x2x1
jax: 0.10.0
libtpu: 0.0.40
codegen_flags: <defaults>
</compile_context>

<pallas_src>
import functools

import jax
import jax.numpy as jnp
from jax import lax
from jax.experimental import pallas as pl
from jax.experimental.pallas import tpu as pltpu

# ----------------------- small synthetic shapes -----------------------------
B = 2            # number of text samples
T = 8            # token sequence length
V = 64           # synthetic vocab size
D = 128          # CLIP / W latent dim  (cfg.model.network.dim)
H = 128          # hidden width of the (simplified) diffusion prior MLP
C, IH, IW = 3, 16, 16       # synthesised image, NCHW
P = C * IH * IW             # flattened image size (768)
TOTAL_STEPS = 4             # synthetic diffusion timesteps

CLIP_MEAN = jnp.array([0.48145466, 0.4578275, 0.40821073], jnp.float32)
CLIP_STD = jnp.array([0.26862954, 0.26130258, 0.27577711], jnp.float32)

_VMEM = pl.BlockSpec(memory_space=pltpu.MemorySpace.VMEM)
_SMEM = pl.BlockSpec(memory_space=pltpu.MemorySpace.SMEM)


# ----------------------------- fused Pallas kernel ---------------------------
def _fused_forward_kernel(*refs, t_list, steps, cond_scale, truncation,
                          n_txt, n, nspt, has_edit):
    """embed_text -> diffusion prior (CFG) -> synthesis -> embed_image -> cosine.

    All weights live in VMEM for the whole call; everything is row-wise so the
    padded batch rows never mix with the real ones.
    """
    (tok_ref, w0_ref, token_emb_ref, txt_w_ref, txt_b_ref,
     time_ref, w1w_ref, w1c_ref, b1_ref, w2_ref, b2_ref,
     syn_w_ref, syn_b_ref, ns_ref, nh_ref, pw_ref, pb_ref) = refs[:17]
    i = 17
    edit_ref = None
    if has_edit:
        edit_ref = refs[i]
        i += 1
    img_ref, sim_ref = refs[i], refs[i + 1]

    n_pad = w0_ref.shape[0]
    bf16 = jnp.bfloat16

    # ---------------- Clipper.embed_text (simplified) ------------------------
    # Mean-pooled token embedding via an SMEM-driven row gather, then a small
    # projection.  Equivalent to one_hot(tokens).mean(1) @ token_emb @ W + b.
    inv_t = 1.0 / float(T)
    emb_rows = []
    for b in range(n_txt):
        acc = token_emb_ref[pl.ds(tok_ref[b * T], 1), :]
        for t in range(1, T):
            acc = acc + token_emb_ref[pl.ds(tok_ref[b * T + t], 1), :]
        emb_rows.append(acc * inv_t)
    emb = jnp.concatenate(emb_rows, axis=0) if n_txt > 1 else emb_rows[0]   # (n_txt, D)
    text_src = (jnp.dot(emb, txt_w_ref[...], preferred_element_type=jnp.float32)
                + txt_b_ref[...])                                            # (n_txt, D)

    # repeat_interleave(n_samples_per_txt) + pad to n_pad rows (static indices).
    rows = [text_src[r // nspt:r // nspt + 1, :] for r in range(n)]
    if n_pad > n:
        rows.append(jnp.zeros((n_pad - n, D), jnp.float32))
    text = jnp.concatenate(rows, axis=0) if len(rows) > 1 else rows[0]       # (n_pad, D)

    # ---------------- diffusion_prior.sample (classifier-free guidance) ------
    # First-layer split:  x @ W1 == w @ w1w + cond @ w1c.
    # text @ w1c and time_emb @ w1c do not depend on the step, hoist them.
    w1w = w1w_ref[...]
    w1c = w1c_ref[...]
    w2 = w2_ref[...]
    b1 = b1_ref[...]
    b2 = b2_ref[...]
    h_text = jnp.dot(text.astype(bf16), w1c, preferred_element_type=jnp.float32)
    h_time = jnp.dot(time_ref[...].astype(bf16), w1c,
                     preferred_element_type=jnp.float32)                     # (STEPS, H)

    w = w0_ref[...]                                                          # (n_pad, D) f32
    inv_steps = 1.0 / float(steps)
    for t in t_list:                                    # static, tiny trip count
        h_shared = jnp.dot(w.astype(bf16), w1w, preferred_element_type=jnp.float32)
        h_t = h_time[t:t + 1, :]                                             # (1, H)
        h_c = jnp.maximum(h_shared + h_text + h_t + b1, 0.0)
        eps_c = jnp.dot(h_c.astype(bf16), w2, preferred_element_type=jnp.float32) + b2
        if cond_scale == 1.0:
            eps_g = eps_c                     # unconditional branch is dead code
        else:
            h_u = jnp.maximum(h_shared + h_t + b1, 0.0)
            eps_u = jnp.dot(h_u.astype(bf16), w2,
                            preferred_element_type=jnp.float32) + b2
            eps_g = eps_u + cond_scale * (eps_c - eps_u)
        w = w - inv_steps * eps_g

    w = truncation * w
    if has_edit:
        w = w + edit_ref[...]

    # ---------------- G.synthesis --------------------------------------------
    img = jnp.tanh(jnp.dot(w.astype(bf16), syn_w_ref[...],
                           preferred_element_type=jnp.float32) + syn_b_ref[...])
    img_ref[...] = img                                   # NCHW flatten, in [-1, 1]

    # ---------------- Clipper.embed_image ------------------------------------
    # Literal reference semantics: normalize(0.5*img + 0.5).clamp(0, 1), then a
    # second normalize folded into the projection weights/bias at init time.
    x = jnp.clip(img * ns_ref[...] + nh_ref[...], 0.0, 1.0)
    feat = (jnp.dot(x.astype(bf16), pw_ref[...], preferred_element_type=jnp.float32)
            + pb_ref[...])                                                   # (n_pad, D)

    # ---------------- torch.cosine_similarity (eps = 1e-8) -------------------
    eps2 = 1e-16                                         # = (1e-8)^2
    dotp = jnp.sum(feat * text, axis=-1, keepdims=True)
    ff = jnp.sum(feat * feat, axis=-1, keepdims=True)
    tt = jnp.sum(text * text, axis=-1, keepdims=True)
    sim = dotp * lax.rsqrt(jnp.maximum(ff, eps2)) * lax.rsqrt(jnp.maximum(tt, eps2))
    # Lane-dense output (n_pad, 128): broadcast across lanes, wrapper takes col 0.
    sim_ref[...] = jnp.broadcast_to(sim, sim_ref.shape)


# ---------------------------- parameters --------------------------------------
def init_params(key):
    ks = jax.random.split(key, 8)
    s = 0.02
    token_emb = s * jax.random.normal(ks[0], (V, D), jnp.float32)
    txt_proj_w = s * jax.random.normal(ks[1], (D, D), jnp.float32)
    prior_w1w = s * jax.random.normal(ks[2], (D, H), jnp.float32)
    prior_w1c = s * jax.random.normal(ks[3], (D, H), jnp.float32)
    prior_w2 = s * jax.random.normal(ks[4], (H, D), jnp.float32)
    time_emb = s * jax.random.normal(ks[5], (TOTAL_STEPS, D), jnp.float32)
    syn_w = s * jax.random.normal(ks[6], (D, P), jnp.float32)
    img_proj_w = s * jax.random.normal(ks[7], (P, D), jnp.float32)
    img_proj_b = jnp.zeros((D,), jnp.float32)

    # Flattened (per-element, channel-repeated) CLIP normalisation constants.
    mean_p = jnp.repeat(CLIP_MEAN, IH * IW)          # (P,)
    inv_std_p = jnp.repeat(1.0 / CLIP_STD, IH * IW)  # (P,)

    return dict(
        token_emb=token_emb,
        txt_proj_w=txt_proj_w,
        txt_proj_b=jnp.zeros((1, D), jnp.float32),
        # Prior MLP first layer, split so the shared w @ w1w product is reused.
        prior_w1w=prior_w1w.astype(jnp.bfloat16),        # (D, H)
        prior_w1c=prior_w1c.astype(jnp.bfloat16),        # (D, H)
        prior_b1=jnp.zeros((1, H), jnp.float32),
        prior_w2=prior_w2.astype(jnp.bfloat16),          # (H, D)
        prior_b2=jnp.zeros((1, D), jnp.float32),
        time_emb=time_emb,
        syn_w=syn_w.astype(jnp.bfloat16),                # (D, P)
        syn_b=jnp.zeros((1, P), jnp.float32),
        # First normalize of embed_image folded to an affine: (0.5*img+0.5-mean)/std.
        norm1_scale=(0.5 * inv_std_p).reshape(1, P),
        norm1_shift=((0.5 - mean_p) * inv_std_p).reshape(1, P),
        # Second normalize folded into the projection: y = ((x-mean)/std) @ W + b.
        img_proj_w=(inv_std_p[:, None] * img_proj_w).astype(jnp.bfloat16),
        img_proj_b=(img_proj_b - (mean_p * inv_std_p) @ img_proj_w).reshape(1, D),
    )


# ---------------------------- forward ------------------------------------------
def clip2stylegan_forward(params, tokens, key, n_samples_per_txt=1, cond_scale=1.0,
                          truncation=1.0, skips=1, clip_sort=False, edit=None):
    """Mirrors Clip2StyleGAN.forward with the synthetic component models."""
    # TODO(synk): clip.tokenize(text_samples) (BPE tokenizer) has no Pallas
    # equivalent; synthetic integer token ids are taken as input instead.
    n_txt = tokens.shape[0]
    n = n_txt * n_samples_per_txt
    n_pad = ((n + 7) // 8) * 8                       # sublane-aligned batch
    steps = max(TOTAL_STEPS // skips, 1)             # set_timestep_skip(skips)
    t_list = tuple(min(i * skips, TOTAL_STEPS - 1) for i in range(steps))

    tokens_flat = tokens.reshape(-1).astype(jnp.int32)          # (n_txt*T,) -> SMEM
    w0 = jax.random.normal(key, (n_pad, D), jnp.float32)        # sampled pre-padded

    args = [tokens_flat, w0,
            params["token_emb"], params["txt_proj_w"], params["txt_proj_b"],
            params["time_emb"], params["prior_w1w"], params["prior_w1c"],
            params["prior_b1"], params["prior_w2"], params["prior_b2"],
            params["syn_w"], params["syn_b"],
            params["norm1_scale"], params["norm1_shift"],
            params["img_proj_w"], params["img_proj_b"]]
    has_edit = edit is not None
    if has_edit:
        edit_arr = jnp.broadcast_to(jnp.asarray(edit, jnp.float32), (n, D))
        args.append(jnp.pad(edit_arr, ((0, n_pad - n), (0, 0))))

    kernel = functools.partial(
        _fused_forward_kernel, t_list=t_list, steps=steps,
        cond_scale=float(cond_scale), truncation=float(truncation),
        n_txt=n_txt, n=n, nspt=n_samples_per_txt, has_edit=has_edit)

    # Single fused call; ~0.6 MB of weights stay resident in VMEM -> no grid,
    # no multi-buffering, no cross-TC split (batch is tiny).
    img_flat_pad, sim_pad = pl.pallas_call(
        kernel,
        out_shape=(jax.ShapeDtypeStruct((n_pad, P), jnp.float32),
                   jax.ShapeDtypeStruct((n_pad, 128), jnp.float32)),
        in_specs=[_SMEM] + [_VMEM] * (len(args) - 1),
        out_specs=(_VMEM, _VMEM),
    )(*args)

    images = img_flat_pad[:n].reshape(n, C, IH, IW)             # NCHW
    similarity = sim_pad[:n, 0]

    if clip_sort:
        # torch.sort(descending=True) equivalent kept in plain JAX.
        idxs = jnp.argsort(-similarity)
        similarity = similarity[idxs]
        images = images[idxs, ...]
    return images, similarity


# ---------------------------------- main --------------------------------------
if __name__ == "__main__":
    key = jax.random.PRNGKey(0)
    pkey, tkey, skey = jax.random.split(key, 3)

    params = init_params(pkey)
    tokens = jax.random.randint(tkey, (B, T), 0, V, dtype=jnp.int32)

    # TODO(synk): F.interpolate(image, (224,224), mode='area') is skipped — the
    # synthetic image is embedded at its native 16x16 resolution.
    images, similarity = clip2stylegan_forward(
        params, tokens, skey,
        n_samples_per_txt=1, cond_scale=1.0, truncation=1.0,
        skips=1, clip_sort=False, edit=None)

    jax.block_until_ready((images, similarity))
    assert images.shape == (B, C, IH, IW)
    assert similarity.shape == (B,)
    assert bool(jnp.all(jnp.isfinite(images))) and bool(jnp.all(jnp.isfinite(similarity)))
    print("KERNEL_OK")
</pallas_src>

<mosaic_0001>
module attributes {stable_mosaic.version = 11 : i64} {
  func.func @_fused_forward_kernel(%arg0: memref<16xi32, #tpu.memory_space<smem>>, %arg1: memref<8x128xf32, #tpu.memory_space<vmem>>, %arg2: memref<64x128xf32, #tpu.memory_space<vmem>>, %arg3: memref<128x128xf32, #tpu.memory_space<vmem>>, %arg4: memref<1x128xf32, #tpu.memory_space<vmem>>, %arg5: memref<4x128xf32, #tpu.memory_space<vmem>>, %arg6: memref<128x128xbf16, #tpu.memory_space<vmem>>, %arg7: memref<128x128xbf16, #tpu.memory_space<vmem>>, %arg8: memref<1x128xf32, #tpu.memory_space<vmem>>, %arg9: memref<128x128xbf16, #tpu.memory_space<vmem>>, %arg10: memref<1x128xf32, #tpu.memory_space<vmem>>, %arg11: memref<128x768xbf16, #tpu.memory_space<vmem>>, %arg12: memref<1x768xf32, #tpu.memory_space<vmem>>, %arg13: memref<1x768xf32, #tpu.memory_space<vmem>>, %arg14: memref<1x768xf32, #tpu.memory_space<vmem>>, %arg15: memref<768x128xbf16, #tpu.memory_space<vmem>>, %arg16: memref<1x128xf32, #tpu.memory_space<vmem>>, %arg17: memref<8x768xf32, #tpu.memory_space<vmem>>, %arg18: memref<8x128xf32, #tpu.memory_space<vmem>>) attributes {dimension_semantics = [], scalar_prefetch = 0 : i64, scratch_operands = 0 : i64, tpu.core_type = #tpu.core_type<tc>} {
    %c0 = arith.constant 0 : index
    %0 = memref.load %arg0[%c0] : memref<16xi32, #tpu.memory_space<smem>>
    %1 = arith.index_cast %0 : i32 to index
    %c0_0 = arith.constant 0 : index
    %2 = vector.load %arg2[%1, %c0_0] : memref<64x128xf32, #tpu.memory_space<vmem>>, vector<1x128xf32>
    %c1 = arith.constant 1 : index
    %3 = memref.load %arg0[%c1] : memref<16xi32, #tpu.memory_space<smem>>
    %4 = arith.index_cast %3 : i32 to index
    %c0_1 = arith.constant 0 : index
    %5 = vector.load %arg2[%4, %c0_1] : memref<64x128xf32, #tpu.memory_space<vmem>>, vector<1x128xf32>
    %6 = arith.addf %2, %5 : vector<1x128xf32>
    %c2 = arith.constant 2 : index
    %7 = memref.load %arg0[%c2] : memref<16xi32, #tpu.memory_space<smem>>
    %8 = arith.index_cast %7 : i32 to index
    %c0_2 = arith.constant 0 : index
    %9 = vector.load %arg2[%8, %c0_2] : memref<64x128xf32, #tpu.memory_space<vmem>>, vector<1x128xf32>
    %10 = arith.addf %6, %9 : vector<1x128xf32>
    %c3 = arith.constant 3 : index
    %11 = memref.load %arg0[%c3] : memref<16xi32, #tpu.memory_space<smem>>
    %12 = arith.index_cast %11 : i32 to index
    %c0_3 = arith.constant 0 : index
    %13 = vector.load %arg2[%12, %c0_3] : memref<64x128xf32, #tpu.memory_space<vmem>>, vector<1x128xf32>
    %14 = arith.addf %10, %13 : vector<1x128xf32>
    %c4 = arith.constant 4 : index
    %15 = memref.load %arg0[%c4] : memref<16xi32, #tpu.memory_space<smem>>
    %16 = arith.index_cast %15 : i32 to index
    %c0_4 = arith.constant 0 : index
    %17 = vector.load %arg2[%16, %c0_4] : memref<64x128xf32, #tpu.memory_space<vmem>>, vector<1x128xf32>
    %18 = arith.addf %14, %17 : vector<1x128xf32>
    %c5 = arith.constant 5 : index
    %19 = memref.load %arg0[%c5] : memref<16xi32, #tpu.memory_space<smem>>
    %20 = arith.index_cast %19 : i32 to index
    %c0_5 = arith.constant 0 : index
    %21 = vector.load %arg2[%20, %c0_5] : memref<64x128xf32, #tpu.memory_space<vmem>>, vector<1x128xf32>
    %22 = arith.addf %18, %21 : vector<1x128xf32>
    %c6 = arith.constant 6 : index
    %23 = memref.load %arg0[%c6] : memref<16xi32, #tpu.memory_space<smem>>
    %24 = arith.index_cast %23 : i32 to index
    %c0_6 = arith.constant 0 : index
    %25 = vector.load %arg2[%24, %c0_6] : memref<64x128xf32, #tpu.memory_space<vmem>>, vector<1x128xf32>
    %26 = arith.addf %22, %25 : vector<1x128xf32>
    %c7 = arith.constant 7 : index
    %27 = memref.load %arg0[%c7] : memref<16xi32, #tpu.memory_space<smem>>
    %28 = arith.index_cast %27 : i32 to index
    %c0_7 = arith.constant 0 : index
    %29 = vector.load %arg2[%28, %c0_7] : memref<64x128xf32, #tpu.memory_space<vmem>>, vector<1x128xf32>
    %30 = arith.addf %26, %29 : vector<1x128xf32>
    %cst = arith.constant 1.250000e-01 : f32
    %31 = vector.broadcast %cst : f32 to vector<1x128xf32>
    %32 = arith.mulf %30, %31 : vector<1x128xf32>
    %c8 = arith.constant 8 : index
    %33 = memref.load %arg0[%c8] : memref<16xi32, #tpu.memory_space<smem>>
    %34 = arith.index_cast %33 : i32 to index
    %c0_8 = arith.constant 0 : index
    %35 = vector.load %arg2[%34, %c0_8] : memref<64x128xf32, #tpu.memory_space<vmem>>, vector<1x128xf32>
    %c9 = arith.constant 9 : index
    %36 = memref.load %arg0[%c9] : memref<16xi32, #tpu.memory_space<smem>>
    %37 = arith.index_cast %36 : i32 to index
    %c0_9 = arith.constant 0 : index
    %38 = vector.load %arg2[%37, %c0_9] : memref<64x128xf32, #tpu.memory_space<vmem>>, vector<1x128xf32>
    %39 = arith.addf %35, %38 : vector<1x128xf32>
    %c10 = arith.constant 10 : index
    %40 = memref.load %arg0[%c10] : memref<16xi32, #tpu.memory_space<smem>>
    %41 = arith.index_cast %40 : i32 to index
    %c0_10 = arith.constant 0 : index
    %42 = vector.load %arg2[%41, %c0_10] : memref<64x128xf32, #tpu.memory_space<vmem>>, vector<1x128xf32>
    %43 = arith.addf %39, %42 : vector<1x128xf32>
    %c11 = arith.constant 11 : index
    %44 = memref.load %arg0[%c11] : memref<16xi32, #tpu.memory_space<smem>>
    %45 = arith.index_cast %44 : i32 to index
    %c0_11 = arith.constant 0 : index
    %46 = vector.load %arg2[%45, %c0_11] : memref<64x128xf32, #tpu.memory_space<vmem>>, vector<1x128xf32>
    %47 = arith.addf %43, %46 : vector<1x128xf32>
    %c12 = arith.constant 12 : index
    %48 = memref.load %arg0[%c12] : memref<16xi32, #tpu.memory_space<smem>>
    %49 = arith.index_cast %48 : i32 to index
    %c0_12 = arith.constant 0 : index
    %50 = vector.load %arg2[%49, %c0_12] : memref<64x128xf32, #tpu.memory_space<vmem>>, vector<1x128xf32>
    %51 = arith.addf %47, %50 : vector<1x128xf32>
    %c13 = arith.constant 13 : index
    %52 = memref.load %arg0[%c13] : memref<16xi32, #tpu.memory_space<smem>>
    %53 = arith.index_cast %52 : i32 to index
    %c0_13 = arith.constant 0 : index
    %54 = vector.load %arg2[%53, %c0_13] : memref<64x128xf32, #tpu.memory_space<vmem>>, vector<1x128xf32>
    %55 = arith.addf %51, %54 : vector<1x128xf32>
    %c14 = arith.constant 14 : index
    %56 = memref.load %arg0[%c14] : memref<16xi32, #tpu.memory_space<smem>>
    %57 = arith.index_cast %56 : i32 to index
    %c0_14 = arith.constant 0 : index
    %58 = vector.load %arg2[%57, %c0_14] : memref<64x128xf32, #tpu.memory_space<vmem>>, vector<1x128xf32>
    %59 = arith.addf %55, %58 : vector<1x128xf32>
    %c15 = arith.constant 15 : index
    %60 = memref.load %arg0[%c15] : memref<16xi32, #tpu.memory_space<smem>>
    %61 = arith.index_cast %60 : i32 to index
    %c0_15 = arith.constant 0 : index
    %62 = vector.load %arg2[%61, %c0_15] : memref<64x128xf32, #tpu.memory_space<vmem>>, vector<1x128xf32>
    %63 = arith.addf %59, %62 : vector<1x128xf32>
    %cst_16 = arith.constant 1.250000e-01 : f32
    %64 = vector.broadcast %cst_16 : f32 to vector<1x128xf32>
    %65 = arith.mulf %63, %64 : vector<1x128xf32>
    %66 = tpu.concatenate %32, %65 in 0 : vector<1x128xf32>, vector<1x128xf32> -> vector<2x128xf32>
    %c0_17 = arith.constant 0 : index
    %c0_18 = arith.constant 0 : index
    %67 = vector.load %arg3[%c0_17, %c0_18] : memref<128x128xf32, #tpu.memory_space<vmem>>, vector<128x128xf32>
    %cst_19 = arith.constant dense<0.000000e+00> : vector<2x128xf32>
    %68 = tpu.matmul %66, %67, %cst_19 {dimension_numbers = #tpu.dot_dimension_numbers<[1], [0], [0], [1], [0, 0, 1, 1], [], []>} : vector<2x128xf32>, vector<128x128xf32>, vector<2x128xf32> -> vector<2x128xf32>
    %c0_20 = arith.constant 0 : index
    %c0_21 = arith.constant 0 : index
    %69 = vector.load %arg4[%c0_20, %c0_21] : memref<1x128xf32, #tpu.memory_space<vmem>>, vector<1x128xf32>
    %70 = vector.broadcast %69 : vector<1x128xf32> to vector<2x128xf32>
    %71 = arith.addf %68, %70 : vector<2x128xf32>
    %72 = vector.extract_strided_slice %71 {offsets = [0, 0], sizes = [1, 128], strides = [1, 1]} : vector<2x128xf32> to vector<1x128xf32>
    %73 = vector.extract_strided_slice %71 {offsets = [1, 0], sizes = [1, 128], strides = [1, 1]} : vector<2x128xf32> to vector<1x128xf32>
    %cst_22 = arith.constant 0.000000e+00 : f32
    %74 = vector.broadcast %cst_22 : f32 to vector<6x128xf32>
    %75 = tpu.concatenate %72, %73, %74 in 0 : vector<1x128xf32>, vector<1x128xf32>, vector<6x128xf32> -> vector<8x128xf32>
    %c0_23 = arith.constant 0 : index
    %c0_24 = arith.constant 0 : index
    %76 = vector.load %arg6[%c0_23, %c0_24] : memref<128x128xbf16, #tpu.memory_space<vmem>>, vector<128x128xbf16>
    %c0_25 = arith.constant 0 : index
    %c0_26 = arith.constant 0 : index
    %77 = vector.load %arg7[%c0_25, %c0_26] : memref<128x128xbf16, #tpu.memory_space<vmem>>, vector<128x128xbf16>
    %c0_27 = arith.constant 0 : index
    %c0_28 = arith.constant 0 : index
    %78 = vector.load %arg9[%c0_27, %c0_28] : memref<128x128xbf16, #tpu.memory_space<vmem>>, vector<128x128xbf16>
    %c0_29 = arith.constant 0 : index
    %c0_30 = arith.constant 0 : index
    %79 = vector.load %arg8[%c0_29, %c0_30] : memref<1x128xf32, #tpu.memory_space<vmem>>, vector<1x128xf32>
    %c0_31 = arith.constant 0 : index
    %c0_32 = arith.constant 0 : index
    %80 = vector.load %arg10[%c0_31, %c0_32] : memref<1x128xf32, #tpu.memory_space<vmem>>, vector<1x128xf32>
    %81 = arith.truncf %75 : vector<8x128xf32> to vector<8x128xbf16>
    %cst_33 = arith.constant dense<0.000000e+00> : vector<8x128xf32>
    %82 = tpu.matmul %81, %77, %cst_33 {dimension_numbers = #tpu.dot_dimension_numbers<[1], [0], [0], [1], [0, 0, 1, 1], [], []>} : vector<8x128xbf16>, vector<128x128xbf16>, vector<8x128xf32> -> vector<8x128xf32>
    %c0_34 = arith.constant 0 : index
    %c0_35 = arith.constant 0 : index
    %83 = vector.load %arg5[%c0_34, %c0_35] : memref<4x128xf32, #tpu.memory_space<vmem>>, vector<4x128xf32>
    %84 = arith.truncf %83 : vector<4x128xf32> to vector<4x128xbf16>
    %cst_36 = arith.constant dense<0.000000e+00> : vector<4x128xf32>
    %85 = tpu.matmul %84, %77, %cst_36 {dimension_numbers = #tpu.dot_dimension_numbers<[1], [0], [0], [1], [0, 0, 1, 1], [], []>} : vector<4x128xbf16>, vector<128x128xbf16>, vector<4x128xf32> -> vector<4x128xf32>
    %c0_37 = arith.constant 0 : index
    %c0_38 = arith.constant 0 : index
    %86 = vector.load %arg1[%c0_37, %c0_38] : memref<8x128xf32, #tpu.memory_space<vmem>>, vector<8x128xf32>
    %87 = arith.truncf %86 : vector<8x128xf32> to vector<8x128xbf16>
    %cst_39 = arith.constant dense<0.000000e+00> : vector<8x128xf32>
    %88 = tpu.matmul %87, %76, %cst_39 {dimension_numbers = #tpu.dot_dimension_numbers<[1], [0], [0], [1], [0, 0, 1, 1], [], []>} : vector<8x128xbf16>, vector<128x128xbf16>, vector<8x128xf32> -> vector<8x128xf32>
    %89 = vector.extract_strided_slice %85 {offsets = [0, 0], sizes = [1, 128], strides = [1, 1]} : vector<4x128xf32> to vector<1x128xf32>
    %90 = arith.addf %88, %82 : vector<8x128xf32>
    %91 = vector.broadcast %89 : vector<1x128xf32> to vector<8x128xf32>
    %92 = arith.addf %90, %91 : vector<8x128xf32>
    %93 = vector.broadcast %79 : vector<1x128xf32> to vector<8x128xf32>
    %94 = arith.addf %92, %93 : vector<8x128xf32>
    %cst_40 = arith.constant 0.000000e+00 : f32
    %95 = vector.broadcast %cst_40 : f32 to vector<8x128xf32>
    %96 = arith.maximumf %94, %95 : vector<8x128xf32>
    %97 = arith.truncf %96 : vector<8x128xf32> to vector<8x128xbf16>
    %cst_41 = arith.constant dense<0.000000e+00> : vector<8x128xf32>
    %98 = tpu.matmul %97, %78, %cst_41 {dimension_numbers = #tpu.dot_dimension_numbers<[1], [0], [0], [1], [0, 0, 1, 1], [], []>} : vector<8x128xbf16>, vector<128x128xbf16>, vector<8x128xf32> -> vector<8x128xf32>
    %99 = vector.broadcast %80 : vector<1x128xf32> to vector<8x128xf32>
    %100 = arith.addf %98, %99 : vector<8x128xf32>
    %cst_42 = arith.constant 2.500000e-01 : f32
    %101 = vector.broadcast %cst_42 : f32 to vector<8x128xf32>
    %102 = arith.mulf %101, %100 : vector<8x128xf32>
    %103 = arith.subf %86, %102 : vector<8x128xf32>
    %104 = arith.truncf %103 : vector<8x128xf32> to vector<8x128xbf16>
    %cst_43 = arith.constant dense<0.000000e+00> : vector<8x128xf32>
    %105 = tpu.matmul %104, %76, %cst_43 {dimension_numbers = #tpu.dot_dimension_numbers<[1], [0], [0], [1], [0, 0, 1, 1], [], []>} : vector<8x128xbf16>, vector<128x128xbf16>, vector<8x128xf32> -> vector<8x128xf32>
    %106 = vector.extract_strided_slice %85 {offsets = [1, 0], sizes = [1, 128], strides = [1, 1]} : vector<4x128xf32> to vector<1x128xf32>
    %107 = arith.addf %105, %82 : vector<8x128xf32>
    %108 = vector.broadcast %106 : vector<1x128xf32> to vector<8x128xf32>
    %109 = arith.addf %107, %108 : vector<8x128xf32>
    %110 = vector.broadcast %79 : vector<1x128xf32> to vector<8x128xf32>
    %111 = arith.addf %109, %110 : vector<8x128xf32>
    %cst_44 = arith.constant 0.000000e+00 : f32
    %112 = vector.broadcast %cst_44 : f32 to vector<8x128xf32>
    %113 = arith.maximumf %111, %112 : vector<8x128xf32>
    %114 = arith.truncf %113 : vector<8x128xf32> to vector<8x128xbf16>
    %cst_45 = arith.constant dense<0.000000e+00> : vector<8x128xf32>
    %115 = tpu.matmul %114, %78, %cst_45 {dimension_numbers = #tpu.dot_dimension_numbers<[1], [0], [0], [1], [0, 0, 1, 1], [], []>} : vector<8x128xbf16>, vector<128x128xbf16>, vector<8x128xf32> -> vector<8x128xf32>
    %116 = vector.broadcast %80 : vector<1x128xf32> to vector<8x128xf32>
    %117 = arith.addf %115, %116 : vector<8x128xf32>
    %cst_46 = arith.constant 2.500000e-01 : f32
    %118 = vector.broadcast %cst_46 : f32 to vector<8x128xf32>
    %119 = arith.mulf %118, %117 : vector<8x128xf32>
    %120 = arith.subf %103, %119 : vector<8x128xf32>
    %121 = arith.truncf %120 : vector<8x128xf32> to vector<8x128xbf16>
    %cst_47 = arith.constant dense<0.000000e+00> : vector<8x128xf32>
    %122 = tpu.matmul %121, %76, %cst_47 {dimension_numbers = #tpu.dot_dimension_numbers<[1], [0], [0], [1], [0, 0, 1, 1], [], []>} : vector<8x128xbf16>, vector<128x128xbf16>, vector<8x128xf32> -> vector<8x128xf32>
    %123 = vector.extract_strided_slice %85 {offsets = [2, 0], sizes = [1, 128], strides = [1, 1]} : vector<4x128xf32> to vector<1x128xf32>
    %124 = arith.addf %122, %82 : vector<8x128xf32>
    %125 = vector.broadcast %123 : vector<1x128xf32> to vector<8x128xf32>
    %126 = arith.addf %124, %125 : vector<8x128xf32>
    %127 = vector.broadcast %79 : vector<1x128xf32> to vector<8x128xf32>
    %128 = arith.addf %126, %127 : vector<8x128xf32>
    %cst_48 = arith.constant 0.000000e+00 : f32
    %129 = vector.broadcast %cst_48 : f32 to vector<8x128xf32>
    %130 = arith.maximumf %128, %129 : vector<8x128xf32>
    %131 = arith.truncf %130 : vector<8x128xf32> to vector<8x128xbf16>
    %cst_49 = arith.constant dense<0.000000e+00> : vector<8x128xf32>
    %132 = tpu.matmul %131, %78, %cst_49 {dimension_numbers = #tpu.dot_dimension_numbers<[1], [0], [0], [1], [0, 0, 1, 1], [], []>} : vector<8x128xbf16>, vector<128x128xbf16>, vector<8x128xf32> -> vector<8x128xf32>
    %133 = vector.broadcast %80 : vector<1x128xf32> to vector<8x128xf32>
    %134 = arith.addf %132, %133 : vector<8x128xf32>
    %cst_50 = arith.constant 2.500000e-01 : f32
    %135 = vector.broadcast %cst_50 : f32 to vector<8x128xf32>
    %136 = arith.mulf %135, %134 : vector<8x128xf32>
    %137 = arith.subf %120, %136 : vector<8x128xf32>
    %138 = arith.truncf %137 : vector<8x128xf32> to vector<8x128xbf16>
    %cst_51 = arith.constant dense<0.000000e+00> : vector<8x128xf32>
    %139 = tpu.matmul %138, %76, %cst_51 {dimension_numbers = #tpu.dot_dimension_numbers<[1], [0], [0], [1], [0, 0, 1, 1], [], []>} : vector<8x128xbf16>, vector<128x128xbf16>, vector<8x128xf32> -> vector<8x128xf32>
    %140 = vector.extract_strided_slice %85 {offsets = [3, 0], sizes = [1, 128], strides = [1, 1]} : vector<4x128xf32> to vector<1x128xf32>
    %141 = arith.addf %139, %82 : vector<8x128xf32>
    %142 = vector.broadcast %140 : vector<1x128xf32> to vector<8x128xf32>
    %143 = arith.addf %141, %142 : vector<8x128xf32>
    %144 = vector.broadcast %79 : vector<1x128xf32> to vector<8x128xf32>
    %145 = arith.addf %143, %144 : vector<8x128xf32>
    %cst_52 = arith.constant 0.000000e+00 : f32
    %146 = vector.broadcast %cst_52 : f32 to vector<8x128xf32>
    %147 = arith.maximumf %145, %146 : vector<8x128xf32>
    %148 = arith.truncf %147 : vector<8x128xf32> to vector<8x128xbf16>
    %cst_53 = arith.constant dense<0.000000e+00> : vector<8x128xf32>
    %149 = tpu.matmul %148, %78, %cst_53 {dimension_numbers = #tpu.dot_dimension_numbers<[1], [0], [0], [1], [0, 0, 1, 1], [], []>} : vector<8x128xbf16>, vector<128x128xbf16>, vector<8x128xf32> -> vector<8x128xf32>
    %150 = vector.broadcast %80 : vector<1x128xf32> to vector<8x128xf32>
    %151 = arith.addf %149, %150 : vector<8x128xf32>
    %cst_54 = arith.constant 2.500000e-01 : f32
    %152 = vector.broadcast %cst_54 : f32 to vector<8x128xf32>
    %153 = arith.mulf %152, %151 : vector<8x128xf32>
    %154 = arith.subf %137, %153 : vector<8x128xf32>
    %cst_55 = arith.constant 1.000000e+00 : f32
    %155 = vector.broadcast %cst_55 : f32 to vector<8x128xf32>
    %156 = arith.mulf %155, %154 : vector<8x128xf32>
    %157 = arith.truncf %156 : vector<8x128xf32> to vector<8x128xbf16>
    %c0_56 = arith.constant 0 : index
    %c0_57 = arith.constant 0 : index
    %158 = vector.load %arg11[%c0_56, %c0_57] : memref<128x768xbf16, #tpu.memory_space<vmem>>, vector<128x768xbf16>
    %cst_58 = arith.constant dense<0.000000e+00> : vector<8x768xf32>
    %159 = tpu.matmul %157, %158, %cst_58 {dimension_numbers = #tpu.dot_dimension_numbers<[1], [0], [0], [1], [0, 0, 1, 1], [], []>} : vector<8x128xbf16>, vector<128x768xbf16>, vector<8x768xf32> -> vector<8x768xf32>
    %c0_59 = arith.constant 0 : index
    %c0_60 = arith.constant 0 : index
    %160 = vector.load %arg12[%c0_59, %c0_60] : memref<1x768xf32, #tpu.memory_space<vmem>>, vector<1x768xf32>
    %161 = vector.broadcast %160 : vector<1x768xf32> to vector<8x768xf32>
    %162 = arith.addf %159, %161 : vector<8x768xf32>
    %163 = math.tanh %162 : vector<8x768xf32>
    %c0_61 = arith.constant 0 : index
    %c0_62 = arith.constant 0 : index
    %164 = vector.load %arg17[%c0_61, %c0_62] : memref<8x768xf32, #tpu.memory_space<vmem>>, vector<8x768xf32>
    tpu.vector_store %arg17[%c0_61, %c0_62], %163 {strides = array<i32>} : memref<8x768xf32, #tpu.memory_space<vmem>>, vector<8x768xf32>,
    %c0_63 = arith.constant 0 : index
    %c0_64 = arith.constant 0 : index
    %165 = vector.load %arg13[%c0_63, %c0_64] : memref<1x768xf32, #tpu.memory_space<vmem>>, vector<1x768xf32>
    %166 = vector.broadcast %165 : vector<1x768xf32> to vector<8x768xf32>
    %167 = arith.mulf %163, %166 : vector<8x768xf32>
    %c0_65 = arith.constant 0 : index
    %c0_66 = arith.constant 0 : index
    %168 = vector.load %arg14[%c0_65, %c0_66] : memref<1x768xf32, #tpu.memory_space<vmem>>, vector<1x768xf32>
    %169 = vector.broadcast %168 : vector<1x768xf32> to vector<8x768xf32>
    %170 = arith.addf %167, %169 : vector<8x768xf32>
    %cst_67 = arith.constant 0.000000e+00 : f32
    %cst_68 = arith.constant 1.000000e+00 : f32
    %171 = vector.broadcast %cst_67 : f32 to vector<8x768xf32>
    %172 = arith.maximumf %171, %170 : vector<8x768xf32>
    %173 = vector.broadcast %cst_68 : f32 to vector<8x768xf32>
    %174 = arith.minimumf %173, %172 : vector<8x768xf32>
    %175 = arith.truncf %174 : vector<8x768xf32> to vector<8x768xbf16>
    %c0_69 = arith.constant 0 : index
    %c0_70 = arith.constant 0 : index
    %176 = vector.load %arg15[%c0_69, %c0_70] : memref<768x128xbf16, #tpu.memory_space<vmem>>, vector<768x128xbf16>
    %cst_71 = arith.constant dense<0.000000e+00> : vector<8x128xf32>
    %177 = tpu.matmul %175, %176, %cst_71 {dimension_numbers = #tpu.dot_dimension_numbers<[1], [0], [0], [1], [0, 0, 1, 1], [], []>} : vector<8x768xbf16>, vector<768x128xbf16>, vector<8x128xf32> -> vector<8x128xf32>
    %c0_72 = arith.constant 0 : index
    %c0_73 = arith.constant 0 : index
    %178 = vector.load %arg16[%c0_72, %c0_73] : memref<1x128xf32, #tpu.memory_space<vmem>>, vector<1x128xf32>
    %179 = vector.broadcast %178 : vector<1x128xf32> to vector<8x128xf32>
    %180 = arith.addf %177, %179 : vector<8x128xf32>
    %181 = arith.mulf %180, %75 : vector<8x128xf32>
    %cst_74 = arith.constant dense<0.000000e+00> : vector<8xf32>
    %182 = vector.multi_reduction <add>, %181, %cst_74 [1] : vector<8x128xf32> to vector<8xf32>
    %183 = vector.shape_cast %182 : vector<8xf32> to vector<8x1xf32>
    %184 = arith.mulf %180, %180 : vector<8x128xf32>
    %cst_75 = arith.constant dense<0.000000e+00> : vector<8xf32>
    %185 = vector.multi_reduction <add>, %184, %cst_75 [1] : vector<8x128xf32> to vector<8xf32>
    %186 = vector.shape_cast %185 : vector<8xf32> to vector<8x1xf32>
    %187 = arith.mulf %75, %75 : vector<8x128xf32>
    %cst_76 = arith.constant dense<0.000000e+00> : vector<8xf32>
    %188 = vector.multi_reduction <add>, %187, %cst_76 [1] : vector<8x128xf32> to vector<8xf32>
    %189 = vector.shape_cast %188 : vector<8xf32> to vector<8x1xf32>
    %cst_77 = arith.constant 1.000000e-16 : f32
    %190 = vector.broadcast %cst_77 : f32 to vector<8x1xf32>
    %191 = arith.maximumf %186, %190 : vector<8x1xf32>
    %192 = math.rsqrt %191 : vector<8x1xf32>
    %193 = arith.mulf %183, %192 : vector<8x1xf32>
    %cst_78 = arith.constant 1.000000e-16 : f32
    %194 = vector.broadcast %cst_78 : f32 to vector<8x1xf32>
    %195 = arith.maximumf %189, %194 : vector<8x1xf32>
    %196 = math.rsqrt %195 : vector<8x1xf32>
    %197 = arith.mulf %193, %196 : vector<8x1xf32>
    %198 = vector.shape_cast %197 : vector<8x1xf32> to vector<8x1xf32>
    %199 = vector.broadcast %198 : vector<8x1xf32> to vector<8x128xf32>
    %c0_79 = arith.constant 0 : index
    %c0_80 = arith.constant 0 : index
    %200 = vector.load %arg18[%c0_79, %c0_80] : memref<8x128xf32, #tpu.memory_space<vmem>>, vector<8x128xf32>
    tpu.vector_store %arg18[%c0_79, %c0_80], %199 {strides = array<i32>} : memref<8x128xf32, #tpu.memory_space<vmem>>, vector<8x128xf32>,
    return
  }
}

</mosaic_0001>

<bundles_post_ra>
// kernel: tpu_custom_call.1
= control target key start
LH: loop header
LB: loop body
LE: loop exit
PB: predicated region body
PF: predicated region fallthrough
CT: control target
= control target key end

     0   :  { %s3867_s0 = inlined_call_operand.hbm [shape: s32[16], index: 0, kind: input, shape index: {}]   ;;  %s3868_s1 = inlined_call_operand.hbm [shape: f32[8,128], index: 1, kind: input, shape index: {}]   ;;  %s3869_s2 = inlined_call_operand.hbm [shape: f32[64,128], index: 2, kind: input, shape index: {}]   ;;  %s3870_s3 = inlined_call_operand.hbm [shape: f32[128,128], index: 3, kind: input, shape index: {}]   ;;  %s3871_s4 = inlined_call_operand.hbm [shape: f32[1,128], index: 4, kind: input, shape index: {}]   ;;  %s3872_s5 = inlined_call_operand.hbm [shape: f32[4,128], index: 5, kind: input, shape index: {}]   ;;  %s3873_s6 = inlined_call_operand.hbm [shape: bf16[128,128], index: 6, kind: input, shape index: {}]   ;;  %s3874_s7 = inlined_call_operand.hbm [shape: bf16[128,128], index: 7, kind: input, shape index: {}]   ;;  %s3875_s8 = inlined_call_operand.vmem [shape: f32[1,128], index: 8, kind: input, shape index: {}]   ;;  %s3876_s9 = inlined_call_operand.hbm [shape: bf16[128,128], index: 9, kind: input, shape index: {}]   ;;  %s3877_s10 = inlined_call_operand.vmem [shape: f32[1,128], index: 10, kind: input, shape index: {}]   ;;  %s3878_s11 = inlined_call_operand.hbm [shape: bf16[128,768], index: 11, kind: input, shape index: {}]   ;;  %s3879_s12 = inlined_call_operand.vmem [shape: f32[1,768], index: 12, kind: input, shape index: {}]   ;;  %s3880_s13 = inlined_call_operand.vmem [shape: f32[1,768], index: 13, kind: input, shape index: {}]   ;;  %s3881_s14 = inlined_call_operand.vmem [shape: f32[1,768], index: 14, kind: input, shape index: {}]   ;;  %s3882_s15 = inlined_call_operand.hbm [shape: bf16[768,128], index: 15, kind: input, shape index: {}]   ;;  %s3883_s16 = inlined_call_operand.vmem [shape: f32[1,128], index: 16, kind: input, shape index: {}]   ;;  %s3884_s17 = inlined_call_operand.hbm [shape: f32[8,768], index: 17, kind: output, shape index: {0}]   ;;  %s3885_s18 = inlined_call_operand.hbm [shape: f32[8,128], index: 18, kind: output, shape index: {1}]  }
   0x1   :  { %3893 = sst [smem:[#allocation33_spill]] %s3867_s0 }
   0x2   :  { %3894 = sst [smem:[#allocation34_spill]] %s3868_s1 }
   0x3   :  { %3895 = sst [smem:[#allocation35_spill]] %s3869_s2 }
   0x4   :  { %3896 = sst [smem:[#allocation36_spill]] %s3884_s17 }
   0x5   :  { %3897 = sst [smem:[#allocation37_spill]] %s3885_s18 }
   0x6   :  { %24 = vsyncpa [#allocation5], 0 }
   0x7   :  { %25 = vsyncpa [#allocation3], 0 }
   0x8   :  { %26 = vsyncpa [#allocation8], 0 }
   0x9   :  { %27 = vsyncpa [#allocation11], 0 }
   0xa   :  { %28 = vsyncpa [#allocation14], 0 }
   0xb   :  { %29 = vsyncpa [#allocation17], 0 }
   0xc   :  { %30 = vsyncpa [#allocation20], 0 }
   0xd   :  { %31 = vsyncpa [#allocation4], 0 }
   0xe   :  { %32 = vsyncpa [#allocation23], 0  ;;  %s3197_s27 = smov [#allocation7]   ;;  %s3898_s0 = sld [smem:[#allocation35_spill]] }
   0xf   :  { %s56_s28 = sshll.u32 %s3197_s27, 4  ;;  %s57_s28 = int_to_ptr.vmem [resolvable:$true] %s56_s28 }
  0x14   :  { %s2905_s19 = scalar_lea.hbm %s3898_s0, 1024 }
  0x15   :  { %p2906_p0 = scmp.ne.s32.totalorder %s3898_s0, %s2905_s19  ;;  %p2909_p1 = scmp.lt.u32.totalorder %s2905_s19, %s3898_s0 }
  0x17   :  { %p2911_p2 = pnand %p2909_p1, %p2906_p0 }
  0x19   :  { %2914 = shalt.err (!%p2911_p2)
}
  0x1a   :  { %s2915_s2 = scalar_lea.vmem %s57_s28, 1024  ;;  %p2920_p4 = scmp.lt.s32.totalorder %s57_s28, %s57_s28 }
  0x1b   :  { %p2916_p3 = scmp.ne.s32.totalorder %s57_s28, %s2915_s2  ;;  %p2921_p5 = scmp.lt.s32.totalorder %s2915_s2, %s2915_s2 }
  0x1d   :  { %p2922_p6 = por %p2921_p5, %p2920_p4 }
  0x1f   :  { %p2923_p7 = pnand %p2922_p6, %p2916_p3 }
  0x21   :  { %2926 = shalt.err (!%p2923_p7)
}
  0x22   :  { %s3198_s23 = smov 128   ;;  %s3199_s24 = smov 8  }
  0x23   :  { %62 = dma.hbm_to_vmem [thread:$0]  %s3898_s0, 1024, %s57_s28, [#allocation8], %s3198_s23, %s3198_s23, %s3199_s24  }
  0x24   :  { %s3200_s27 = smov [#allocation10]   ;;  %s3201_s30 = smov [#allocation13]  }
  0x25   :  { %s81_s29 = sshll.u32 %s3200_s27, 4  ;;  %s100_s19 = sshll.u32 %s3201_s30, 4  ;;  %s82_s29 = int_to_ptr.vmem [resolvable:$true] %s81_s29  ;;  %s101_s19 = int_to_ptr.vmem [resolvable:$true] %s100_s19 }
  0x26   :  { %s2927_s21 = scalar_lea.hbm %s3871_s4, 16 }
  0x27   :  { %p2928_p8 = scmp.ne.s32.totalorder %s3871_s4, %s2927_s21  ;;  %p2931_p9 = scmp.lt.u32.totalorder %s2927_s21, %s3871_s4 }
  0x29   :  { %p2933_p10 = pnand %p2931_p9, %p2928_p8 }
  0x2b   :  { %2936 = shalt.err (!%p2933_p10)
}
  0x2c   :  { %s2937_s28 = scalar_lea.vmem %s82_s29, 16  ;;  %s2941_s0 = scalar_lea.vmem %s82_s29, 32 }
  0x2d   :  { %p2938_p11 = scmp.ne.s32.totalorder %s82_s29, %s2937_s28  ;;  %p2942_p12 = scmp.lt.s32.totalorder %s82_s29, %s82_s29 }
  0x2e   :  { %p2943_p13 = scmp.lt.s32.totalorder %s2941_s0, %s2937_s28 }
  0x30   :  { %p2944_p0 = por %p2943_p13, %p2942_p12 }
  0x32   :  { %p2945_p1 = pnand %p2944_p0, %p2938_p11 }
  0x34   :  { %2948 = shalt.err (!%p2945_p1)
}
  0x35   :  { %84 = dma.hbm_to_vmem [thread:$0]  %s3871_s4, 16, %s82_s29, [#allocation11]  }
  0x36   :  { %s2949_s17 = scalar_lea.hbm %s3873_s6, 1024 }
  0x37   :  { %p2950_p2 = scmp.ne.s32.totalorder %s3873_s6, %s2949_s17  ;;  %p2953_p3 = scmp.lt.u32.totalorder %s2949_s17, %s3873_s6 }
  0x39   :  { %p2955_p4 = pnand %p2953_p3, %p2950_p2 }
  0x3b   :  { %2958 = shalt.err (!%p2955_p4)
}
  0x3c   :  { %s2959_s22 = scalar_lea.vmem %s101_s19, 1024  ;;  %p2964_p6 = scmp.lt.s32.totalorder %s101_s19, %s101_s19 }
  0x3d   :  { %p2960_p5 = scmp.ne.s32.totalorder %s101_s19, %s2959_s22  ;;  %p2965_p7 = scmp.lt.s32.totalorder %s2959_s22, %s2959_s22 }
  0x3f   :  { %p2966_p8 = por %p2965_p7, %p2964_p6 }
  0x41   :  { %p2967_p9 = pnand %p2966_p8, %p2960_p5 }
  0x43   :  { %2970 = shalt.err (!%p2967_p9)
}
  0x44   :  { %s3891_s4 = smov 64   ;;  %s3203_s29 = smov 4  }
  0x45   :  { %106 = dma.hbm_to_vmem [thread:$0]  %s3873_s6, 1024, %s101_s19, [#allocation14], %s3891_s4, %s3891_s4, %s3203_s29  }
  0x46   :  { %s3204_s0 = smov [#allocation16]   ;;  %s2971_s30 = scalar_lea.hbm %s3876_s9, 1024 }
  0x47   :  { %s126_s25 = sshll.u32 %s3204_s0, 4  ;;  %p2972_p10 = scmp.ne.s32.totalorder %s3876_s9, %s2971_s30  ;;  %s127_s25 = int_to_ptr.vmem [resolvable:$true] %s126_s25 }
  0x48   :  { %p2975_p11 = scmp.lt.u32.totalorder %s2971_s30, %s3876_s9 }
  0x4a   :  { %p2977_p12 = pnand %p2975_p11, %p2972_p10 }
  0x4c   :  { %2980 = shalt.err (!%p2977_p12)
}
  0x4d   :  { %s2981_s21 = scalar_lea.vmem %s127_s25, 1024  ;;  %p2986_p0 = scmp.lt.s32.totalorder %s127_s25, %s127_s25 }
  0x4e   :  { %p2982_p13 = scmp.ne.s32.totalorder %s127_s25, %s2981_s21  ;;  %p2987_p1 = scmp.lt.s32.totalorder %s2981_s21, %s2981_s21 }
  0x50   :  { %p2988_p2 = por %p2987_p1, %p2986_p0 }
  0x52   :  { %p2989_p3 = pnand %p2988_p2, %p2982_p13 }
  0x54   :  { %2992 = shalt.err (!%p2989_p3)
}
  0x55   :  { %132 = dma.hbm_to_vmem [thread:$0]  %s3876_s9, 1024, %s127_s25, [#allocation17], %s3891_s4, %s3891_s4, %s3203_s29  }
  0x56   :  { %s3899_s28 = sld [smem:[#allocation33_spill]] }
  0x5c   :  { %s2993_s0 = scalar_lea.hbm %s3899_s28, 16 }
  0x5d   :  { %p2994_p4 = scmp.ne.s32.totalorder %s3899_s28, %s2993_s0  ;;  %p2997_p5 = scmp.lt.u32.totalorder %s2993_s0, %s3899_s28 }
  0x5f   :  { %p2999_p6 = pnand %p2997_p5, %p2994_p4 }
  0x61   :  { %3002 = shalt.err (!%p2999_p6)
}
  0x62   :  { %s3205_s18 = smov [#allocation2]   ;;  %s3206_s9 = smov [#allocation6]  }
  0x63   :  { %40 = dma.hbm_to_smem %s3899_s28, 16, %s3205_s18, [#allocation5]  }
  0x64   :  { %s47_s25 = sshll.u32 %s3206_s9, 4  ;;  %s3207_s21 = smov [#allocation9]   ;;  %s48_s25 = int_to_ptr.vmem [resolvable:$true] %s47_s25 }
  0x65   :  { %s68_s6 = sshll.u32 %s3207_s21, 4  ;;  %s3900_s2 = sld [smem:[#allocation34_spill]]  ;;  %s69_s6 = int_to_ptr.vmem [resolvable:$true] %s68_s6 }
  0x6b   :  { %s3003_s26 = scalar_lea.hbm %s3900_s2, 128 }
  0x6c   :  { %p3004_p7 = scmp.ne.s32.totalorder %s3900_s2, %s3003_s26  ;;  %p3007_p8 = scmp.lt.u32.totalorder %s3003_s26, %s3900_s2 }
  0x6e   :  { %p3009_p9 = pnand %p3007_p8, %p3004_p7 }
  0x70   :  { %3012 = shalt.err (!%p3009_p9)
}
  0x71   :  { %s3013_s28 = scalar_lea.vmem %s48_s25, 128  ;;  %p3018_p11 = scmp.lt.s32.totalorder %s48_s25, %s48_s25 }
  0x72   :  { %p3014_p10 = scmp.ne.s32.totalorder %s48_s25, %s3013_s28  ;;  %p3019_p12 = scmp.lt.s32.totalorder %s3013_s28, %s3013_s28 }
  0x74   :  { %p3020_p13 = por %p3019_p12, %p3018_p11 }
  0x76   :  { %p3021_p0 = pnand %p3020_p13, %p3014_p10 }
  0x78   :  { %3024 = shalt.err (!%p3021_p0)
}
  0x79   :  { %50 = dma.hbm_to_vmem [thread:$0]  %s3900_s2, 128, %s48_s25, [#allocation3]  }
  0x7a   :  { %s3025_s20 = scalar_lea.hbm %s3870_s3, 2048 }
  0x7b   :  { %p3026_p1 = scmp.ne.s32.totalorder %s3870_s3, %s3025_s20  ;;  %p3029_p2 = scmp.lt.u32.totalorder %s3025_s20, %s3870_s3 }
  0x7d   :  { %p3031_p3 = pnand %p3029_p2, %p3026_p1 }
  0x7f   :  { %3034 = shalt.err (!%p3031_p3)
}
  0x80   :  { %s3035_s26 = scalar_lea.vmem %s69_s6, 2048  ;;  %p3040_p5 = scmp.lt.s32.totalorder %s69_s6, %s69_s6 }
  0x81   :  { %p3036_p4 = scmp.ne.s32.totalorder %s69_s6, %s3035_s26  ;;  %p3041_p6 = scmp.lt.s32.totalorder %s3035_s26, %s3035_s26 }
  0x83   :  { %p3042_p7 = por %p3041_p6, %p3040_p5 }
  0x85   :  { %p3043_p8 = pnand %p3042_p7, %p3036_p4 }
  0x87   :  { %3046 = shalt.err (!%p3043_p8)
}
  0x88   :  { %74 = dma.hbm_to_vmem [thread:$0]  %s3870_s3, 2048, %s69_s6, [#allocation8], %s3198_s23, %s3198_s23, %s3199_s24  }
  0x89   :  { %s3208_s27 = smov [#allocation12]   ;;  %s3209_s30 = smov [#allocation15]  }
  0x8a   :  { %s91_s0 = sshll.u32 %s3208_s27, 4  ;;  %s112_s28 = sshll.u32 %s3209_s30, 4  ;;  %s92_s0 = int_to_ptr.vmem [resolvable:$true] %s91_s0  ;;  %s113_s28 = int_to_ptr.vmem [resolvable:$true] %s112_s28 }
  0x8b   :  { %s3047_s4 = scalar_lea.hbm %s3872_s5, 64 }
  0x8c   :  { %p3048_p9 = scmp.ne.s32.totalorder %s3872_s5, %s3047_s4  ;;  %p3051_p10 = scmp.lt.u32.totalorder %s3047_s4, %s3872_s5 }
  0x8e   :  { %p3053_p11 = pnand %p3051_p10, %p3048_p9 }
  0x90   :  { %3056 = shalt.err (!%p3053_p11)
}
  0x91   :  { %s3057_s3 = scalar_lea.vmem %s92_s0, 64  ;;  %p3062_p13 = scmp.lt.s32.totalorder %s92_s0, %s92_s0 }
  0x92   :  { %p3058_p12 = scmp.ne.s32.totalorder %s92_s0, %s3057_s3  ;;  %p3063_p0 = scmp.lt.s32.totalorder %s3057_s3, %s3057_s3 }
  0x94   :  { %p3064_p1 = por %p3063_p0, %p3062_p13 }
  0x96   :  { %p3065_p2 = pnand %p3064_p1, %p3058_p12 }
  0x98   :  { %3068 = shalt.err (!%p3065_p2)
}
  0x99   :  { %94 = dma.hbm_to_vmem [thread:$0]  %s3872_s5, 64, %s92_s0, [#allocation11]  }
  0x9a   :  { %s3069_s22 = scalar_lea.hbm %s3874_s7, 1024 }
  0x9b   :  { %p3070_p3 = scmp.ne.s32.totalorder %s3874_s7, %s3069_s22  ;;  %p3073_p4 = scmp.lt.u32.totalorder %s3069_s22, %s3874_s7 }
  0x9d   :  { %p3075_p5 = pnand %p3073_p4, %p3070_p3 }
  0x9f   :  { %3078 = shalt.err (!%p3075_p5)
}
  0xa0   :  { %s3079_s30 = scalar_lea.vmem %s113_s28, 1024  ;;  %p3084_p7 = scmp.lt.s32.totalorder %s113_s28, %s113_s28 }
  0xa1   :  { %p3080_p6 = scmp.ne.s32.totalorder %s113_s28, %s3079_s30  ;;  %p3085_p8 = scmp.lt.s32.totalorder %s3079_s30, %s3079_s30 }
  0xa3   :  { %p3086_p9 = por %p3085_p8, %p3084_p7 }
  0xa5   :  { %p3087_p10 = pnand %p3086_p9, %p3080_p6 }
  0xa7   :  { %3090 = shalt.err (!%p3087_p10)
}
  0xa8   :  { %s3901_s5 = smov 64   ;;  %s3210_s18 = smov [#allocation18]  }
  0xa9   :  { %118 = dma.hbm_to_vmem [thread:$0]  %s3874_s7, 1024, %s113_s28, [#allocation14], %s3901_s5, %s3901_s5, %s3203_s29  }
  0xaa   :  { %s140_s4 = sshll.u32 %s3210_s18, 4  ;;  %s3091_s9 = scalar_lea.hbm %s3878_s11, 6144  ;;  %s141_s4 = int_to_ptr.vmem [resolvable:$true] %s140_s4 }
  0xab   :  { %p3092_p11 = scmp.ne.s32.totalorder %s3878_s11, %s3091_s9  ;;  %p3095_p12 = scmp.lt.u32.totalorder %s3091_s9, %s3878_s11 }
  0xad   :  { %p3097_p13 = pnand %p3095_p12, %p3092_p11 }
  0xaf   :  { %3100 = shalt.err (!%p3097_p13)
}
  0xb0   :  { %s3101_s6 = scalar_lea.vmem %s141_s4, 6144  ;;  %p3106_p1 = scmp.lt.s32.totalorder %s141_s4, %s141_s4 }
  0xb1   :  { %p3102_p0 = scmp.ne.s32.totalorder %s141_s4, %s3101_s6  ;;  %p3107_p2 = scmp.lt.s32.totalorder %s3101_s6, %s3101_s6 }
  0xb3   :  { %p3108_p3 = por %p3107_p2, %p3106_p1 }
  0xb5   :  { %p3109_p4 = pnand %p3108_p3, %p3102_p0 }
  0xb7   :  { %3112 = shalt.err (!%p3109_p4)
}
  0xb8   :  { %s3211_s7 = smov 384   ;;  %s3212_s28 = smov 24  }
  0xb9   :  { %146 = dma.hbm_to_vmem [thread:$0]  %s3878_s11, 6144, %s141_s4, [#allocation17], %s3211_s7, %s3211_s7, %s3212_s28  }
  0xba   :  { %s3213_s26 = smov [#allocation19]   ;;  %s3113_s30 = scalar_lea.hbm %s3882_s15, 6144 }
  0xbb   :  { %s158_s25 = sshll.u32 %s3213_s26, 4  ;;  %p3114_p5 = scmp.ne.s32.totalorder %s3882_s15, %s3113_s30  ;;  %s159_s25 = int_to_ptr.vmem [resolvable:$true] %s158_s25 }
  0xbc   :  { %p3117_p6 = scmp.lt.u32.totalorder %s3113_s30, %s3882_s15 }
  0xbe   :  { %p3119_p7 = pnand %p3117_p6, %p3114_p5 }
  0xc0   :  { %3122 = shalt.err (!%p3119_p7)
}
  0xc1   :  { %s3123_s20 = scalar_lea.vmem %s159_s25, 6144  ;;  %p3128_p9 = scmp.lt.s32.totalorder %s159_s25, %s159_s25 }
  0xc2   :  { %p3124_p8 = scmp.ne.s32.totalorder %s159_s25, %s3123_s20  ;;  %p3129_p10 = scmp.lt.s32.totalorder %s3123_s20, %s3123_s20 }
  0xc4   :  { %p3130_p11 = por %p3129_p10, %p3128_p9 }
  0xc6   :  { %p3131_p12 = pnand %p3130_p11, %p3124_p8 }
  0xc8   :  { %3134 = shalt.err (!%p3131_p12)
}
  0xc9   :  { %164 = dma.hbm_to_vmem [thread:$0]  %s3882_s15, 6144, %s159_s25, [#allocation20], %s3901_s5, %s3901_s5, %s3203_s29  }
  0xca   :  { %3179 = dma.done.wait [#allocation5], 16  }
  0xcb   :  { %3180 = vsyncadd [#allocation5], 4294967280 }
  0xcc   :  { %3181 = dma.done.wait [#allocation3], 128  }
  0xcd   :  { %3182 = vsyncadd [#allocation3], 4294967168 }
  0xce   :  { %3183 = dma.done.wait [#allocation8], 3072  }
  0xcf   :  { %3184 = vsyncadd [#allocation8], 4294964224 }
  0xd0   :  { %3185 = dma.done.wait [#allocation11], 80  }
  0xd1   :  { %3186 = vsyncadd [#allocation11], 4294967216 }
  0xd2   :  { %3187 = dma.done.wait [#allocation14], 2048  }
  0xd3   :  { %3188 = vsyncadd [#allocation14], 4294965248 }
  0xd4   :  { %3189 = dma.done.wait [#allocation17], 7168  }
  0xd5   :  { %3190 = vsyncadd [#allocation17], 4294960128 }
  0xd6   :  { %3191 = dma.done.wait [#allocation20], 6144  }
  0xd7   :  { %3192 = vsyncadd [#allocation20], 4294961152 }
  0xd8   :  { %200 = sfence }
  0xd9   :  { %v271_v0 = vld [vmem:[#allocation9] sm:$0xff]  ;;  %v272_v1 = vld [vmem:[#allocation9 + $0x8] sm:$0xff]  ;;  %v273_v2 = vld [vmem:[#allocation9 + $0x10] sm:$0xff]  ;;  %v3214_v3 = vmov 0.0|0.0   ;;  %vm3215_vm0 = vmmov 0   ;;  %v3216_v6 = vmov 0.0  }
  0xda   :  { %2698 = vmatprep.subr.bf16.mxu0 %v3214_v3  ;;  %v2699_v4 = vpack.c.bf16 %v272_v1, %v271_v0  ;;  %v274_v5 = vld [vmem:[#allocation9 + $0x18] sm:$0xff]  ;;  %2495 = vmatprep.mubr.msk.f32.mxu0 %vm3215_vm0, %v3216_v6  ;;  %s202_s15 = sld [smem:[#allocation2]]  ;;  %s2148_s29 = sld [smem:[#allocation2 + $0x1]]  ;;  %v275_v8 = vld [vmem:[#allocation9 + $0x20] sm:$0xff]  ;;  %v276_v9 = vld [vmem:[#allocation9 + $0x28] sm:$0xff]  ;;  %vm269_vm1 = vcmask 1040384  }
  0xdb   :  { %2498 = vmatprep.subr.bf16.mxu1 %v3216_v6  ;;  %2514 = vmatprep.mubr.msk.bf16.mxu1 %vm3215_vm0, %v3216_v6  ;;  %v2702_v7 = vpack.c.bf16 %v274_v5, %v273_v2  ;;  %s2149_s5 = sld [smem:[#allocation2 + $0x2]]  ;;  %s3472_s9 = sld [smem:[#allocation2 + $0x3]]  ;;  %v3478_v10 = vld [vmem:[#allocation15] sm:$0xff]   ;;  %v277_v11 = vld [vmem:[#allocation9 + $0x30] sm:$0xff]  ;;  %v2705_v12 = vpack.c.bf16 %v276_v9, %v275_v8  ;;  %v278_v14 = vld [vmem:[#allocation9 + $0x38] sm:$0xff]  ;;  %vm364_vm2 = vcmask 1041408  }
  0xdc   :  { %2700 = vmatpush3.bf16.msra.mxu0 %v2699_v4  ;;  %s3474_s21 = sld [smem:[#allocation2 + $0x4]]  ;;  %s3476_s3 = sld [smem:[#allocation2 + $0x5]]  ;;  %2499 = vmatpush3.bf16.msra.mxu1 %v3478_v10  ;;  %v3487_v13 = vld [vmem:[#allocation15 + $0x8] sm:$0xff]   ;;  %v3497_v19 = vld [vmem:[#allocation15 + $0x10] sm:$0xff]   ;;  %v2708_v20 = vpack.c.bf16 %v278_v14, %v277_v11  ;;  %v279_v22 = vld [vmem:[#allocation9 + $0x40] sm:$0xff] }
  0xdd   :  { %2701 = vmatprep.subr.bf16.mxu0 %v3214_v3  ;;  %s3480_s23 = sld [smem:[#allocation2 + $0x6]]  ;;  %s3482_s24 = sld [smem:[#allocation2 + $0x7]]  ;;  %2500 = vmatprep.subr.bf16.mxu1 %v3216_v6  ;;  %v280_v23 = vld [vmem:[#allocation9 + $0x48] sm:$0xff]  ;;  %v281_v27 = vld [vmem:[#allocation9 + $0x50] sm:$0xff]  ;;  %v282_v28 = vld [vmem:[#allocation9 + $0x58] sm:$0xff] }
  0xde   :  { %s3484_s6 = sld [smem:[#allocation2 + $0x8]]  ;;  %s3490_s28 = sld [smem:[#allocation2 + $0x9]]  ;;  %v3508_v31 = vld [vmem:[#allocation15 + $0x18] sm:$0xff]   ;;  %v2711_v32 = vpack.c.bf16 %v280_v23, %v279_v22  ;;  %v2749_v40 = vld [vmem:[#allocation15 + $0x20] sm:$0xff]   ;;  %v2714_v45 = vpack.c.bf16 %v282_v28, %v281_v27  ;;  %v285_v49 = vld [vmem:[#allocation9 + $0x70] sm:$0xff] }
  0xdf   :  { %s3493_s22 = sld [smem:[#allocation2 + $0xa]]  ;;  %s3495_s25 = sld [smem:[#allocation2 + $0xb]]  ;;  %v283_v41 = vld [vmem:[#allocation9 + $0x60] sm:$0xff]  ;;  %v284_v42 = vld [vmem:[#allocation9 + $0x68] sm:$0xff]  ;;  %v286_v50 = vld [vmem:[#allocation9 + $0x78] sm:$0xff] }
  0xe0   :  { %2703 = vmatpush3.bf16.msra.mxu0 %v2702_v7  ;;  %s203_s7 = scalar_lea.vmem [#allocation7], %s202_s15  ;;  %s206_s19 = scalar_lea.vmem [#allocation7], %s2148_s29  ;;  %2501 = vmatpush3.bf16.msra.mxu1 %v3487_v13  ;;  %v2717_v54 = vpack.c.bf16 %v284_v42, %v283_v41  ;;  %v2750_v56 = vld [vmem:[#allocation15 + $0x28] sm:$0xff]   ;;  %v2751_v60 = vld [vmem:[#allocation15 + $0x30] sm:$0xff]   ;;  %v2720_v62 = vpack.c.bf16 %v286_v50, %v285_v49  ;;  %v505_v4 = vld [vmem:[#allocation12] sm:$0xf] }
  0xe1   :  { %2704 = vmatprep.subr.bf16.mxu0 %v3214_v3  ;;  %v204_v15 = vld [vmem:[%s203_s7] sm:$0x1]  ;;  %s210_s26 = scalar_lea.vmem [#allocation7], %s2149_s5  ;;  %s214_s2 = scalar_lea.vmem [#allocation7], %s3472_s9  ;;  %2502 = vmatprep.subr.bf16.mxu1 %v3216_v6  ;;  %v506_v5 = vpack.c.bf16 %v505_v4, %v505_v4  ;;  %vm2172_vm3 = vmpackc.low %vm364_vm2, %vm364_vm2  ;;  %v3559_v11 = vld [vmem:[#allocation13] sm:$0xff]  }
  0xe2   :  { %v207_v16 = vld [vmem:[%s206_s19] sm:$0x1]  ;;  %s218_s27 = scalar_lea.vmem [#allocation7], %s3474_s21  ;;  %s222_s30 = scalar_lea.vmem [#allocation7], %s3476_s3  ;;  %v3570_v14 = vld [vmem:[#allocation13 + $0x10] sm:$0xff]   ;;  %v3617_v22 = vld [vmem:[#allocation16] sm:$0xff]  }
  0xe3   :  { %v208_v17 = vadd.f32 %v207_v16, %v204_v15  ;;  %v211_v18 = vld [vmem:[%s210_s26] sm:$0x1]  ;;  %s3506_s17 = sld [smem:[#allocation2 + $0xc]]  ;;  %s226_s18 = scalar_lea.vmem [#allocation7], %s3480_s23  ;;  %v3578_v16 = vld [vmem:[#allocation13 + $0x20] sm:$0xff]   ;;  %v3620_v23 = vld [vmem:[#allocation16 + $0x8] sm:$0xff]  }
  0xe4   :  { %2706 = vmatpush3.bf16.msra.mxu0 %v2705_v12  ;;  %v215_v21 = vld [vmem:[%s214_s2] sm:$0x1]  ;;  %s235_s0 = scalar_lea.vmem [#allocation7], %s3484_s6  ;;  %s238_s1 = scalar_lea.vmem [#allocation7], %s3490_s28  ;;  %2503 = vmatpush3.bf16.msra.mxu1 %v3497_v19 }
  0xe5   :  { %2707 = vmatprep.subr.bf16.mxu0 %v3214_v3  ;;  %v212_v24 = vadd.f32 %v211_v18, %v208_v17  ;;  %v219_v25 = vld [vmem:[%s218_s27] sm:$0x1]  ;;  %s3512_s20 = sld [smem:[#allocation2 + $0xd]]  ;;  %s242_s11 = scalar_lea.vmem [#allocation7], %s3493_s22  ;;  %2504 = vmatprep.subr.bf16.mxu1 %v3216_v6  ;;  %v3582_v17 = vld [vmem:[#allocation13 + $0x28] sm:$0xff]   ;;  %v3586_v18 = vld [vmem:[#allocation13 + $0x30] sm:$0xff]  }
  0xe6   :  { %v223_v26 = vld [vmem:[%s222_s30] sm:$0x1]  ;;  %s3517_s4 = sld [smem:[#allocation2 + $0xe]]  ;;  %s230_s15 = scalar_lea.vmem [#allocation7], %s3482_s24 }
  0xe7   :  { %v216_v29 = vadd.f32 %v215_v21, %v212_v24  ;;  %v236_v30 = vld [vmem:[%s235_s0] sm:$0x1]  ;;  %s246_s29 = scalar_lea.vmem [#allocation7], %s3495_s25  ;;  %s3522_s5 = sld [smem:[#allocation2 + $0xf]]  ;;  %v3624_v24 = vld [vmem:[#allocation16 + $0x10] sm:$0xff]  }
  0xe8   :  { %2709 = vmatpush3.bf16.msra.mxu0 %v2708_v20  ;;  %v227_v33 = vld [vmem:[%s226_s18] sm:$0x1]  ;;  %2505 = vmatpush3.bf16.msra.mxu1 %v3508_v31  ;;  %v3592_v20 = vld [vmem:[#allocation6] sm:$0xff] }
  0xe9   :  { %v239_v34 = vld [vmem:[%s238_s1] sm:$0x1]  ;;  %2710 = vmatprep.subr.bf16.mxu0 %v3214_v3  ;;  %v220_v35 = vadd.f32 %v219_v25, %v216_v29  ;;  %2506 = vmatprep.subr.bf16.mxu1 %v3216_v6  ;;  %s250_s9 = scalar_lea.vmem [#allocation7], %s3506_s17  ;;  %v548_v21 = vpack.c.bf16 %v3592_v20, %v3592_v20  ;;  %v3639_v29 = vld [vmem:[#allocation16 + $0x28] sm:$0xff]  }
  0xea   :  { %v240_v36 = vadd.f32 %v239_v34, %v236_v30  ;;  %v243_v37 = vld [vmem:[%s242_s11] sm:$0x1] }
  0xeb   :  { %v231_v38 = vld [vmem:[%s230_s15] sm:$0x1]  ;;  %v224_v43 = vadd.f32 %v223_v26, %v220_v35  ;;  %s254_s21 = scalar_lea.vmem [#allocation7], %s3512_s20  ;;  %v3632_v26 = vld [vmem:[#allocation16 + $0x20] sm:$0xff]  }
  0xec   :  { %v247_v39 = vld [vmem:[%s246_s29] sm:$0x1]  ;;  %v244_v44 = vadd.f32 %v243_v37, %v240_v36  ;;  %2712 = vmatpush3.bf16.msra.mxu0 %v2711_v32  ;;  %s258_s3 = scalar_lea.vmem [#allocation7], %s3517_s4  ;;  %2507 = vmatpush3.bf16.msra.mxu1 %v2749_v40  ;;  %v3643_v32 = vld [vmem:[#allocation16 + $0x30] sm:$0xff]  }
  0xed   :  { %2713 = vmatprep.subr.bf16.mxu0 %v3214_v3  ;;  %v228_v46 = vadd.f32 %v227_v33, %v224_v43  ;;  %v251_v48 = vld [vmem:[%s250_s9] sm:$0x1]  ;;  %s262_s23 = scalar_lea.vmem [#allocation7], %s3522_s5  ;;  %2508 = vmatprep.subr.bf16.mxu1 %v3216_v6 }
  0xee   :  { %v248_v47 = vadd.f32 %v247_v39, %v244_v44  ;;  %v255_v53 = vld [vmem:[%s254_s21] sm:$0x1] }
  0xef   :  { %v232_v51 = vadd.f32 %v231_v38, %v228_v46  ;;  %v259_v55 = vld [vmem:[%s258_s3] sm:$0x1]  ;;  %v637_v38 = vlaneseq }
  0xf0   :  { %v252_v52 = vadd.f32 %v251_v48, %v248_v47  ;;  %2715 = vmatpush3.bf16.msra.mxu0 %v2714_v45  ;;  %v263_v59 = vld [vmem:[%s262_s23] sm:$0x1]  ;;  %2509 = vmatpush3.bf16.msra.mxu1 %v2750_v56 }
  0xf1   :  { %2716 = vmatprep.subr.bf16.mxu0 %v3214_v3  ;;  %v233_v57 = vmul.f32 0.125, %v232_v51  ;;  %2510 = vmatprep.subr.bf16.mxu1 %v3216_v6  ;;  %v2163_v7 = vld [vmem:[#allocation10] ss:$0 sm:$0xff]  ;;  %v3653_v39 = vshrl.u32 %v637_v38, 7 }
  0xf2   :  { %v256_v58 = vadd.f32 %v255_v53, %v252_v52  ;;  %v3574_v15 = vld [vmem:[#allocation13 + $0x18] sm:$0xff]  }
  0xf3   :  { %v3628_v25 = vld [vmem:[#allocation16 + $0x18] sm:$0xff]  }
  0xf4   :  { %v260_v61 = vadd.f32 %v259_v55, %v256_v58  ;;  %2718 = vmatpush3.bf16.msra.mxu0 %v2717_v54  ;;  %2511 = vmatpush3.bf16.msra.mxu1 %v2751_v60  ;;  %v3647_v33 = vld [vmem:[#allocation16 + $0x38] sm:$0xff]  }
  0xf5   :  { %2719 = vmatprep.subr.bf16.mxu0 %v3214_v3  ;;  %2512 = vmatprep.subr.bf16.mxu1 %v3216_v6  ;;  %v2752_v3 = vld [vmem:[#allocation15 + $0x38] sm:$0xff]  }
  0xf6   :  { %v264_v63 = vadd.f32 %v263_v59, %v260_v61  ;;  %v3664_v45 = vld [vmem:[%s3875_s8] ss:$0 sm:$0xff]  ;;  %v3711_v61 = vsub.s32 1, %v3653_v39 }
  0xf7   :  { %v3688_v52 = vld [vmem:[%s3877_s10] ss:$0 sm:$0xff] }
  0xf8   :  { %v265_v0 = vmul.f32 0.125, %v264_v63  ;;  %2721 = vmatpush3.bf16.msra.mxu0 %v2720_v62  ;;  %2513 = vmatpush3.bf16.msra.mxu1 %v2752_v3 }
  0xf9   :  { %2518 = vmatprep.subr.bf16.mxu0 %v3216_v6  ;;  %2538 = vmatprep.subr.bf16.mxu1 %v3216_v6 }
  0xfa   :  { %v267_v1 = vrot.slane %v265_v0, 7 }
  0xfc   :  { %v270_v2 = vsel %vm269_vm1, %v233_v57, %v267_v1 }
  0xfd   :  { %2496 = vmatmul.mubr.f32.vlgmr.msra.gmra.mrb[0].mxu0 %v270_v2 }
  0xfe   :  { %2519 = vmatpush3.bf16.msra.mxu0 %v3478_v10  ;;  %2534 = vmatprep.mubr.msk.bf16.mxu0 %vm3215_vm0, %v3216_v6 }
  0xff   :  { %2520 = vmatprep.subr.bf16.mxu0 %v3216_v6 }
 0x102   :  { %2521 = vmatpush3.bf16.msra.mxu0 %v3487_v13  ;;  %v3564_v13 = vld [vmem:[#allocation13 + $0x8] sm:$0xff]  }
 0x103   :  { %2522 = vmatprep.subr.bf16.mxu0 %v3216_v6 }
 0x106   :  { %2523 = vmatpush3.bf16.msra.mxu0 %v3497_v19  ;;  %v3590_v19 = vld [vmem:[#allocation13 + $0x38] sm:$0xff]  }
 0x107   :  { %2524 = vmatprep.subr.bf16.mxu0 %v3216_v6 }
 0x10a   :  { %2525 = vmatpush3.bf16.msra.mxu0 %v3508_v31 }
 0x10b   :  { %2526 = vmatprep.subr.bf16.mxu0 %v3216_v6 }
 0x10e   :  { %2527 = vmatpush3.bf16.msra.mxu0 %v2749_v40  ;;  %v3656_v40 = vsub.s32 0, %v3653_v39 }
 0x10f   :  { %2528 = vmatprep.subr.bf16.mxu0 %v3216_v6 }
 0x112   :  { %2529 = vmatpush3.bf16.msra.mxu0 %v2750_v56 }
 0x113   :  { %2530 = vmatprep.subr.bf16.mxu0 %v3216_v6 }
 0x116   :  { %2531 = vmatpush3.bf16.msra.mxu0 %v2751_v60 }
 0x117   :  { %2532 = vmatprep.subr.bf16.mxu0 %v3216_v6 }
 0x11a   :  { %2533 = vmatpush3.bf16.msra.mxu0 %v2752_v3 }
 0x11b   :  { %2558 = vmatprep.subr.bf16.mxu0 %v3216_v6 }
 0x11d   :  { %2535 = vmatmul.mubr.bf16.vlgmr.msra.gmra.mrb[4].mxu0 %v506_v5 }
 0x11e   :  { %2574 = vmatprep.mubr.msk.bf16.mxu0 %vm3215_vm0, %v3216_v6  ;;  %2559 = vmatpush3.bf16.msra.mxu0 %v3617_v22 }
 0x11f   :  { %2560 = vmatprep.subr.bf16.mxu0 %v3216_v6 }
 0x122   :  { %2561 = vmatpush3.bf16.msra.mxu0 %v3620_v23 }
 0x123   :  { %2562 = vmatprep.subr.bf16.mxu0 %v3216_v6 }
 0x126   :  { %2563 = vmatpush3.bf16.msra.mxu0 %v3624_v24 }
 0x127   :  { %2564 = vmatprep.subr.bf16.mxu0 %v3216_v6 }
 0x12a   :  { %2565 = vmatpush3.bf16.msra.mxu0 %v3628_v25 }
 0x12b   :  { %2566 = vmatprep.subr.bf16.mxu0 %v3216_v6 }
 0x12e   :  { %2567 = vmatpush3.bf16.msra.mxu0 %v3632_v26 }
 0x12f   :  { %2568 = vmatprep.subr.bf16.mxu0 %v3216_v6 }
 0x132   :  { %2569 = vmatpush3.bf16.msra.mxu0 %v3639_v29 }
 0x133   :  { %2570 = vmatprep.subr.bf16.mxu0 %v3216_v6 }
 0x136   :  { %2571 = vmatpush3.bf16.msra.mxu0 %v3643_v32 }
 0x137   :  { %2572 = vmatprep.subr.bf16.mxu0 %v3216_v6 }
 0x13a   :  { %2573 = vmatpush3.bf16.msra.mxu0 %v3647_v33 }
 0x13b   :  { %2598 = vmatprep.subr.bf16.mxu0 %v3216_v6 }
 0x1d0   :  { %v360_v8 = vpop.f32.mrb[0].mxu0 }
 0x1d1   :  { %v3555_v9 = vadd.f32 %v2163_v7, %v360_v8  ;;  %v2497_v10 = vpop.f32.mrb[1].mxu0 }
 0x1d3   :  { %v2173_v12 = vpack.c.bf16 %v3555_v9, %v3555_v9 }
 0x1d5   :  { %2515 = vmatmul.mubr.msk.bf16.vlgmr.msra.gmra.mrb[0].mxu1 %vm2172_vm3, %v2173_v12 }
 0x1d6   :  { %2539 = vmatpush3.bf16.msra.mxu1 %v3559_v11  ;;  %2554 = vmatprep.mubr.msk.bf16.mxu1 %vm3215_vm0, %v3216_v6 }
 0x1d7   :  { %2540 = vmatprep.subr.bf16.mxu1 %v3216_v6 }
 0x1da   :  { %2541 = vmatpush3.bf16.msra.mxu1 %v3564_v13 }
 0x1db   :  { %2542 = vmatprep.subr.bf16.mxu1 %v3216_v6 }
 0x1de   :  { %2543 = vmatpush3.bf16.msra.mxu1 %v3570_v14 }
 0x1df   :  { %2544 = vmatprep.subr.bf16.mxu1 %v3216_v6 }
 0x1e2   :  { %2545 = vmatpush3.bf16.msra.mxu1 %v3574_v15 }
 0x1e3   :  { %2546 = vmatprep.subr.bf16.mxu1 %v3216_v6 }
 0x1e6   :  { %2547 = vmatpush3.bf16.msra.mxu1 %v3578_v16 }
 0x1e7   :  { %2548 = vmatprep.subr.bf16.mxu1 %v3216_v6 }
 0x1ea   :  { %2549 = vmatpush3.bf16.msra.mxu1 %v3582_v17 }
 0x1eb   :  { %2550 = vmatprep.subr.bf16.mxu1 %v3216_v6 }
 0x1ee   :  { %2551 = vmatpush3.bf16.msra.mxu1 %v3586_v18 }
 0x1ef   :  { %2552 = vmatprep.subr.bf16.mxu1 %v3216_v6 }
 0x1f0   :  { %v3637_v27 = vpop.f32.mrb[4].mxu0 }
 0x1f1   :  { %v2536_v28 = vpop.f32.mrb[5].mxu0  ;;  %v640_v41 = vrot.slane %v3637_v27, %v3656_v40  ;;  %v791_v0 = vrot.slane %v3637_v27, %v3711_v61 }
 0x1f2   :  { %2553 = vmatpush3.bf16.msra.mxu1 %v3590_v19  ;;  %v544_v30 = vpop.f32.mrb[6].mxu0 }
 0x1f3   :  { %2578 = vmatprep.subr.bf16.mxu1 %v3216_v6  ;;  %v2537_v31 = vpop.f32.mrb[7].mxu0 }
 0x1f5   :  { %2555 = vmatmul.mubr.bf16.vlgmr.msra.gmra.mrb[4].mxu1 %v548_v21 }
 0x1f6   :  { %2579 = vmatpush3.bf16.msra.mxu1 %v3559_v11  ;;  %2594 = vmatprep.mubr.msk.bf16.mxu1 %vm3215_vm0, %v3216_v6 }
 0x1f7   :  { %2580 = vmatprep.subr.bf16.mxu1 %v3216_v6 }
 0x1fa   :  { %2581 = vmatpush3.bf16.msra.mxu1 %v3564_v13 }
 0x1fb   :  { %2582 = vmatprep.subr.bf16.mxu1 %v3216_v6 }
 0x1fe   :  { %2583 = vmatpush3.bf16.msra.mxu1 %v3570_v14 }
 0x1ff   :  { %2584 = vmatprep.subr.bf16.mxu1 %v3216_v6 }
 0x202   :  { %2585 = vmatpush3.bf16.msra.mxu1 %v3574_v15 }
 0x203   :  { %2586 = vmatprep.subr.bf16.mxu1 %v3216_v6 }
 0x206   :  { %2587 = vmatpush3.bf16.msra.mxu1 %v3578_v16 }
 0x207   :  { %2588 = vmatprep.subr.bf16.mxu1 %v3216_v6 }
 0x20a   :  { %2589 = vmatpush3.bf16.msra.mxu1 %v3582_v17 }
 0x20b   :  { %2590 = vmatprep.subr.bf16.mxu1 %v3216_v6 }
 0x20e   :  { %2591 = vmatpush3.bf16.msra.mxu1 %v3586_v18 }
 0x20f   :  { %2592 = vmatprep.subr.bf16.mxu1 %v3216_v6 }
 0x212   :  { %2593 = vmatpush3.bf16.msra.mxu1 %v3590_v19 }
 0x213   :  { %2618 = vmatprep.subr.bf16.mxu1 %v3216_v6 }
 0x2a8   :  { %v3651_v34 = vpop.f32.mrb[0].mxu1 }
 0x2a9   :  { %v2516_v35 = vpop.f32.mrb[1].mxu1 }
 0x2aa   :  { %v502_v36 = vpop.f32.mrb[2].mxu1 }
 0x2ab   :  { %v2517_v37 = vpop.f32.mrb[3].mxu1 }
 0x2c8   :  { %v631_v42 = vpop.f32.mrb[4].mxu1 }
 0x2c9   :  { %v632_v43 = vadd.f32 %v631_v42, %v3651_v34  ;;  %v2556_v44 = vpop.f32.mrb[5].mxu1 }
 0x2ca   :  { %v634_v46 = vpop.f32.mrb[6].mxu1  ;;  %v2771_v44 = vld [vmem:[#allocation18 + $0x4] ss:$24 sps:$4 sm:$0xff]  }
 0x2cb   :  { %v641_v47 = vadd.f32 %v640_v41, %v632_v43  ;;  %v2557_v48 = vpop.f32.mrb[7].mxu1  ;;  %v2769_v43 = vld [vmem:[#allocation18] ss:$24 sps:$4 sm:$0xff]   ;;  %v2777_v46 = vld [vmem:[#allocation18 + $0x34] ss:$24 sps:$4 sm:$0xff]  }
 0x2cc   :  { %v2789_v48 = vld [vmem:[#allocation18 + $0x94] ss:$24 sps:$4 sm:$0xff]  }
 0x2cd   :  { %v648_v49 = vadd.f32 %v3664_v45, %v641_v47  ;;  %v2781_v47 = vld [vmem:[#allocation18 + $0x60] ss:$24 sps:$4 sm:$0xff]  }
 0x2cf   :  { %v649_v50 = vmax.f32 %v648_v49, 0.0  ;;  %v2787_v49 = vld [vmem:[#allocation18 + $0x90] ss:$24 sps:$4 sm:$0xff]  }
 0x2d1   :  { %v650_v51 = vpack.c.bf16 %v649_v50, %v649_v50  ;;  %v2795_v50 = vld [vmem:[#allocation18 + $0xc4] ss:$24 sps:$4 sm:$0xff]  }
 0x2d3   :  { %2575 = vmatmul.mubr.bf16.vlgmr.msra.gmra.mrb[8].mxu0 %v650_v51  ;;  %v2793_v51 = vld [vmem:[#allocation18 + $0xc0] ss:$24 sps:$4 sm:$0xff]  }
 0x2d4   :  { %2599 = vmatpush3.bf16.msra.mxu0 %v3617_v22  ;;  %2614 = vmatprep.mubr.msk.bf16.mxu0 %vm3215_vm0, %v3216_v6 }
 0x2d5   :  { %2600 = vmatprep.subr.bf16.mxu0 %v3216_v6 }
 0x2d8   :  { %2601 = vmatpush3.bf16.msra.mxu0 %v3620_v23 }
 0x2d9   :  { %2602 = vmatprep.subr.bf16.mxu0 %v3216_v6 }
 0x2dc   :  { %2603 = vmatpush3.bf16.msra.mxu0 %v3624_v24 }
 0x2dd   :  { %2604 = vmatprep.subr.bf16.mxu0 %v3216_v6 }
 0x2e0   :  { %2605 = vmatpush3.bf16.msra.mxu0 %v3628_v25 }
 0x2e1   :  { %2606 = vmatprep.subr.bf16.mxu0 %v3216_v6 }
 0x2e4   :  { %2607 = vmatpush3.bf16.msra.mxu0 %v3632_v26 }
 0x2e5   :  { %2608 = vmatprep.subr.bf16.mxu0 %v3216_v6 }
 0x2e8   :  { %2609 = vmatpush3.bf16.msra.mxu0 %v3639_v29 }
 0x2e9   :  { %2610 = vmatprep.subr.bf16.mxu0 %v3216_v6 }
 0x2ec   :  { %2611 = vmatpush3.bf16.msra.mxu0 %v3643_v32 }
 0x2ed   :  { %2612 = vmatprep.subr.bf16.mxu0 %v3216_v6 }
 0x2f0   :  { %2613 = vmatpush3.bf16.msra.mxu0 %v3647_v33 }
 0x2f1   :  { %2638 = vmatprep.subr.bf16.mxu0 %v3216_v6 }
 0x3a6   :  { %v739_v53 = vpop.f32.mrb[8].mxu0 }
 0x3a7   :  { %v740_v54 = vadd.f32 %v3688_v52, %v739_v53  ;;  %v2576_v55 = vpop.f32.mrb[9].mxu0  ;;  %v2801_v53 = vld [vmem:[#allocation18 + $0xf4] ss:$24 sps:$4 sm:$0xff]  }
 0x3a8   :  { %v742_v56 = vpop.f32.mrb[10].mxu0  ;;  %v3783_v55 = vsub.s32 3, %v3653_v39 }
 0x3a9   :  { %v745_v57 = vmul.f32 0.25, %v740_v54  ;;  %v2577_v58 = vpop.f32.mrb[11].mxu0  ;;  %v2799_v54 = vld [vmem:[#allocation18 + $0xf0] ss:$24 sps:$4 sm:$0xff]  }
 0x3aa   :  { %v973_v58 = vrot.slane %v3637_v27, %v3783_v55 }
 0x3ab   :  { %v746_v59 = vsub.f32 %v3592_v20, %v745_v57 }
 0x3ad   :  { %v747_v60 = vpack.c.bf16 %v746_v59, %v746_v59 }
 0x3af   :  { %2595 = vmatmul.mubr.bf16.vlgmr.msra.gmra.mrb[8].mxu1 %v747_v60 }
 0x3b0   :  { %2619 = vmatpush3.bf16.msra.mxu1 %v3559_v11  ;;  %2634 = vmatprep.mubr.msk.bf16.mxu1 %vm3215_vm0, %v3216_v6 }
 0x3b1   :  { %2620 = vmatprep.subr.bf16.mxu1 %v3216_v6 }
 0x3b4   :  { %2621 = vmatpush3.bf16.msra.mxu1 %v3564_v13 }
 0x3b5   :  { %2622 = vmatprep.subr.bf16.mxu1 %v3216_v6 }
 0x3b8   :  { %2623 = vmatpush3.bf16.msra.mxu1 %v3570_v14 }
 0x3b9   :  { %2624 = vmatprep.subr.bf16.mxu1 %v3216_v6 }
 0x3bc   :  { %2625 = vmatpush3.bf16.msra.mxu1 %v3574_v15 }
 0x3bd   :  { %2626 = vmatprep.subr.bf16.mxu1 %v3216_v6 }
 0x3c0   :  { %2627 = vmatpush3.bf16.msra.mxu1 %v3578_v16 }
 0x3c1   :  { %2628 = vmatprep.subr.bf16.mxu1 %v3216_v6 }
 0x3c4   :  { %2629 = vmatpush3.bf16.msra.mxu1 %v3582_v17 }
 0x3c5   :  { %2630 = vmatprep.subr.bf16.mxu1 %v3216_v6 }
 0x3c8   :  { %2631 = vmatpush3.bf16.msra.mxu1 %v3586_v18 }
 0x3c9   :  { %2632 = vmatprep.subr.bf16.mxu1 %v3216_v6 }
 0x3cc   :  { %2633 = vmatpush3.bf16.msra.mxu1 %v3590_v19 }
 0x3cd   :  { %2658 = vmatprep.subr.bf16.mxu1 %v3216_v6 }
 0x482   :  { %v782_v62 = vpop.f32.mrb[8].mxu1 }
 0x483   :  { %v783_v63 = vadd.f32 %v782_v62, %v3651_v34  ;;  %v2596_v1 = vpop.f32.mrb[9].mxu1 }
 0x484   :  { %v785_v2 = vpop.f32.mrb[10].mxu1 }
 0x485   :  { %v792_v3 = vadd.f32 %v791_v0, %v783_v63  ;;  %v2597_v4 = vpop.f32.mrb[11].mxu1  ;;  %v2772_v2 = vld [vmem:[#allocation18 + $0x8] ss:$24 sps:$4 sm:$0xff]  }
 0x486   :  { %v2780_v4 = vld [vmem:[#allocation18 + $0x3c] ss:$24 sps:$4 sm:$0xff]  }
 0x487   :  { %v793_v5 = vadd.f32 %v3664_v45, %v792_v3 }
 0x489   :  { %v794_v7 = vmax.f32 %v793_v5, 0.0  ;;  %v2778_v5 = vld [vmem:[#allocation18 + $0x38] ss:$24 sps:$4 sm:$0xff]  }
 0x48b   :  { %v795_v8 = vpack.c.bf16 %v794_v7, %v794_v7  ;;  %v2786_v7 = vld [vmem:[#allocation18 + $0x6c] ss:$24 sps:$4 sm:$0xff]  }
 0x48d   :  { %2615 = vmatmul.mubr.bf16.vlgmr.msra.gmra.mrb[12].mxu0 %v795_v8  ;;  %v2792_v8 = vld [vmem:[#allocation18 + $0x9c] ss:$24 sps:$4 sm:$0xff]  }
 0x48e   :  { %2639 = vmatpush3.bf16.msra.mxu0 %v3617_v22  ;;  %2654 = vmatprep.mubr.msk.bf16.mxu0 %vm3215_vm0, %v3216_v6 }
 0x48f   :  { %2640 = vmatprep.subr.bf16.mxu0 %v3216_v6 }
 0x492   :  { %2641 = vmatpush3.bf16.msra.mxu0 %v3620_v23 }
 0x493   :  { %2642 = vmatprep.subr.bf16.mxu0 %v3216_v6 }
 0x496   :  { %2643 = vmatpush3.bf16.msra.mxu0 %v3624_v24 }
 0x497   :  { %2644 = vmatprep.subr.bf16.mxu0 %v3216_v6 }
 0x49a   :  { %2645 = vmatpush3.bf16.msra.mxu0 %v3628_v25 }
 0x49b   :  { %2646 = vmatprep.subr.bf16.mxu0 %v3216_v6 }
 0x49e   :  { %2647 = vmatpush3.bf16.msra.mxu0 %v3632_v26 }
 0x49f   :  { %2648 = vmatprep.subr.bf16.mxu0 %v3216_v6 }
 0x4a2   :  { %2649 = vmatpush3.bf16.msra.mxu0 %v3639_v29 }
 0x4a3   :  { %2650 = vmatprep.subr.bf16.mxu0 %v3216_v6 }
 0x4a6   :  { %2651 = vmatpush3.bf16.msra.mxu0 %v3643_v32 }
 0x4a7   :  { %2652 = vmatprep.subr.bf16.mxu0 %v3216_v6 }
 0x4aa   :  { %2653 = vmatpush3.bf16.msra.mxu0 %v3647_v33 }
 0x4ab   :  { %2678 = vmatprep.subr.bf16.mxu0 %v3216_v6 }
 0x560   :  { %v830_v10 = vpop.f32.mrb[12].mxu0 }
 0x561   :  { %v831_v12 = vadd.f32 %v3688_v52, %v830_v10  ;;  %v2616_v20 = vpop.f32.mrb[13].mxu0  ;;  %v2798_v10 = vld [vmem:[#allocation18 + $0xcc] ss:$24 sps:$4 sm:$0xff]  }
 0x562   :  { %v833_v21 = vpop.f32.mrb[14].mxu0  ;;  %v2802_v20 = vld [vmem:[#allocation18 + $0xf8] ss:$24 sps:$4 sm:$0xff]  }
 0x563   :  { %v836_v28 = vmul.f32 0.25, %v831_v12  ;;  %v2617_v30 = vpop.f32.mrb[15].mxu0  ;;  %v2796_v12 = vld [vmem:[#allocation18 + $0xc8] ss:$24 sps:$4 sm:$0xff]   ;;  %v2807_v21 = vld [vmem:[#allocation18 + $0x124] ss:$24 sps:$4 sm:$0xff]  }
 0x564   :  { %v2810_v30 = vld [vmem:[#allocation18 + $0x12c] ss:$24 sps:$4 sm:$0xff]  }
 0x565   :  { %v837_v31 = vsub.f32 %v746_v59, %v836_v28  ;;  %v2805_v28 = vld [vmem:[#allocation18 + $0x120] ss:$24 sps:$4 sm:$0xff]  }
 0x567   :  { %v838_v35 = vpack.c.bf16 %v837_v31, %v837_v31 }
 0x569   :  { %2635 = vmatmul.mubr.bf16.vlgmr.msra.gmra.mrb[12].mxu1 %v838_v35  ;;  %v2813_v35 = vld [vmem:[#allocation18 + $0x154] ss:$24 sps:$4 sm:$0xff]  }
 0x56a   :  { %2659 = vmatpush3.bf16.msra.mxu1 %v3559_v11  ;;  %2674 = vmatprep.mubr.msk.bf16.mxu1 %vm3215_vm0, %v3216_v6  ;;  %v3754_v11 = vsub.s32 2, %v3653_v39 }
 0x56b   :  { %2660 = vmatprep.subr.bf16.mxu1 %v3216_v6 }
 0x56e   :  { %2661 = vmatpush3.bf16.msra.mxu1 %v3564_v13 }
 0x56f   :  { %2662 = vmatprep.subr.bf16.mxu1 %v3216_v6 }
 0x572   :  { %2663 = vmatpush3.bf16.msra.mxu1 %v3570_v14 }
 0x573   :  { %2664 = vmatprep.subr.bf16.mxu1 %v3216_v6 }
 0x576   :  { %2665 = vmatpush3.bf16.msra.mxu1 %v3574_v15  ;;  %v882_v15 = vrot.slane %v3637_v27, %v3754_v11  ;;  %v2790_v27 = vld [vmem:[#allocation18 + $0x98] ss:$24 sps:$4 sm:$0xff]  }
 0x577   :  { %2666 = vmatprep.subr.bf16.mxu1 %v3216_v6 }
 0x57a   :  { %2667 = vmatpush3.bf16.msra.mxu1 %v3578_v16 }
 0x57b   :  { %2668 = vmatprep.subr.bf16.mxu1 %v3216_v6 }
 0x57e   :  { %2669 = vmatpush3.bf16.msra.mxu1 %v3582_v17 }
 0x57f   :  { %2670 = vmatprep.subr.bf16.mxu1 %v3216_v6 }
 0x582   :  { %2671 = vmatpush3.bf16.msra.mxu1 %v3586_v18 }
 0x583   :  { %2672 = vmatprep.subr.bf16.mxu1 %v3216_v6 }
 0x586   :  { %2673 = vmatpush3.bf16.msra.mxu1 %v3590_v19 }
 0x587   :  { %1341 = vmatprep.subr.bf16.mxu1 %v2771_v44  ;;  %v2820_v44 = vld [vmem:[#allocation18 + $0x40] ss:$24 sps:$4 sm:$0xff]  }
 0x63c   :  { %v873_v13 = vpop.f32.mrb[12].mxu1 }
 0x63d   :  { %v874_v14 = vadd.f32 %v873_v13, %v3651_v34  ;;  %v2636_v16 = vpop.f32.mrb[13].mxu1  ;;  %v2811_v13 = vld [vmem:[#allocation18 + $0x150] ss:$24 sps:$4 sm:$0xff]  }
 0x63e   :  { %v876_v36 = vpop.f32.mrb[14].mxu1  ;;  %v2819_v16 = vld [vmem:[#allocation18 + $0x14] ss:$24 sps:$4 sm:$0xff]  }
 0x63f   :  { %v883_v17 = vadd.f32 %v882_v15, %v874_v14  ;;  %v2637_v37 = vpop.f32.mrb[15].mxu1  ;;  %v2816_v14 = vld [vmem:[#allocation18 + $0x15c] ss:$24 sps:$4 sm:$0xff]   ;;  %v2814_v15 = vld [vmem:[#allocation18 + $0x158] ss:$24 sps:$4 sm:$0xff]   ;;  %v3217_v36 = vmov 0  }
 0x641   :  { %v884_v38 = vadd.f32 %v3664_v45, %v883_v17  ;;  %v2841_v17 = vld [vmem:[#allocation19 + $0x40] sm:$0xff]  }
 0x643   :  { %v885_v18 = vmax.f32 %v884_v38, 0.0 }
 0x645   :  { %v886_v41 = vpack.c.bf16 %v885_v18, %v885_v18 }
 0x647   :  { %2655 = vmatmul.mubr.bf16.vlgmr.msra.gmra.mrb[16].mxu0 %v886_v41 }
 0x648   :  { %2679 = vmatpush3.bf16.msra.mxu0 %v3617_v22  ;;  %2694 = vmatprep.mubr.msk.bf16.mxu0 %vm3215_vm0, %v3216_v6 }
 0x649   :  { %2680 = vmatprep.subr.bf16.mxu0 %v3216_v6 }
 0x64c   :  { %2681 = vmatpush3.bf16.msra.mxu0 %v3620_v23 }
 0x64d   :  { %2682 = vmatprep.subr.bf16.mxu0 %v3216_v6 }
 0x650   :  { %2683 = vmatpush3.bf16.msra.mxu0 %v3624_v24 }
 0x651   :  { %2684 = vmatprep.subr.bf16.mxu0 %v3216_v6 }
 0x654   :  { %2685 = vmatpush3.bf16.msra.mxu0 %v3628_v25 }
 0x655   :  { %2686 = vmatprep.subr.bf16.mxu0 %v3216_v6 }
 0x658   :  { %2687 = vmatpush3.bf16.msra.mxu0 %v3632_v26 }
 0x659   :  { %2688 = vmatprep.subr.bf16.mxu0 %v3216_v6 }
 0x65c   :  { %2689 = vmatpush3.bf16.msra.mxu0 %v3639_v29 }
 0x65d   :  { %2690 = vmatprep.subr.bf16.mxu0 %v3216_v6 }
 0x660   :  { %2691 = vmatpush3.bf16.msra.mxu0 %v3643_v32  ;;  %v2774_v32 = vld [vmem:[#allocation18 + $0xc] ss:$24 sps:$4 sm:$0xff]  }
 0x661   :  { %2692 = vmatprep.subr.bf16.mxu0 %v3216_v6  ;;  %v2775_v6 = vld [vmem:[#allocation18 + $0x30] ss:$24 sps:$4 sm:$0xff]  }
 0x664   :  { %2693 = vmatpush3.bf16.msra.mxu0 %v3647_v33  ;;  %v2783_v33 = vld [vmem:[#allocation18 + $0x64] ss:$24 sps:$4 sm:$0xff]  }
 0x665   :  { %1382 = vmatprep.subr.bf16.mxu0 %v2774_v32  ;;  %v2825_v32 = vld [vmem:[#allocation18 + $0x74] ss:$24 sps:$4 sm:$0xff]  }
 0x71a   :  { %v921_v19 = vpop.f32.mrb[16].mxu0 }
 0x71b   :  { %v922_v22 = vadd.f32 %v3688_v52, %v921_v19  ;;  %v2656_v23 = vpop.f32.mrb[17].mxu0 }
 0x71c   :  { %v924_v24 = vpop.f32.mrb[18].mxu0 }
 0x71d   :  { %v927_v25 = vmul.f32 0.25, %v922_v22  ;;  %v2657_v42 = vpop.f32.mrb[19].mxu0  ;;  %v2817_v24 = vld [vmem:[#allocation18 + $0x10] ss:$24 sps:$4 sm:$0xff]  }
 0x71e   :  { %v2822_v42 = vld [vmem:[#allocation18 + $0x44] ss:$24 sps:$4 sm:$0xff]  }
 0x71f   :  { %v3778_v26 = vsub.f32 %v837_v31, %v927_v25  ;;  %v2808_v31 = vld [vmem:[#allocation18 + $0x128] ss:$24 sps:$4 sm:$0xff]  }
 0x721   :  { %v929_v29 = vpack.c.bf16 %v3778_v26, %v3778_v26 }
 0x723   :  { %2675 = vmatmul.mubr.bf16.vlgmr.msra.gmra.mrb[16].mxu1 %v929_v29  ;;  %v2842_v29 = vld [vmem:[#allocation19] sm:$0xff]  }
 0x724   :  { %1342 = vmatpush1.bf16.msra.mxu1 %v2769_v43  ;;  %1373 = vmatprep.mubr.bf16.mxu1 %v3217_v36  ;;  %v2845_v43 = vld [vmem:[#allocation19 + $0x48] sm:$0xff]  }
 0x725   :  { %1343 = vmatprep.subr.bf16.mxu1 %v2777_v46  ;;  %v2823_v46 = vld [vmem:[#allocation18 + $0x70] ss:$24 sps:$4 sm:$0xff]  }
 0x728   :  { %1344 = vmatpush1.bf16.msra.mxu1 %v2775_v6  ;;  %v2828_v6 = vld [vmem:[#allocation18 + $0xa4] ss:$24 sps:$4 sm:$0xff]  }
 0x729   :  { %1345 = vmatprep.subr.bf16.mxu1 %v2783_v33  ;;  %v2831_v33 = vld [vmem:[#allocation18 + $0xd4] ss:$24 sps:$4 sm:$0xff]  }
 0x72c   :  { %1346 = vmatpush1.bf16.msra.mxu1 %v2781_v47  ;;  %v2829_v47 = vld [vmem:[#allocation18 + $0xd0] ss:$24 sps:$4 sm:$0xff]  }
 0x72d   :  { %1347 = vmatprep.subr.bf16.mxu1 %v2789_v48  ;;  %v2834_v48 = vld [vmem:[#allocation18 + $0x104] ss:$24 sps:$4 sm:$0xff]  }
 0x730   :  { %1348 = vmatpush1.bf16.msra.mxu1 %v2787_v49  ;;  %v2832_v49 = vld [vmem:[#allocation18 + $0x100] ss:$24 sps:$4 sm:$0xff]  }
 0x731   :  { %1349 = vmatprep.subr.bf16.mxu1 %v2795_v50  ;;  %v2837_v50 = vld [vmem:[#allocation18 + $0x134] ss:$24 sps:$4 sm:$0xff]  }
 0x734   :  { %1350 = vmatpush1.bf16.msra.mxu1 %v2793_v51  ;;  %v2835_v51 = vld [vmem:[#allocation18 + $0x130] ss:$24 sps:$4 sm:$0xff]  }
 0x735   :  { %1351 = vmatprep.subr.bf16.mxu1 %v2801_v53  ;;  %v2840_v53 = vld [vmem:[#allocation18 + $0x164] ss:$24 sps:$4 sm:$0xff]  }
 0x738   :  { %1352 = vmatpush1.bf16.msra.mxu1 %v2799_v54  ;;  %v2838_v54 = vld [vmem:[#allocation18 + $0x160] ss:$24 sps:$4 sm:$0xff]  }
 0x739   :  { %1353 = vmatprep.subr.bf16.mxu1 %v2807_v21  ;;  %v2866_v21 = vld [vmem:[#allocation19 + $0x30] sm:$0xff]  }
 0x73c   :  { %1354 = vmatpush1.bf16.msra.mxu1 %v2805_v28  ;;  %v2867_v28 = vld [vmem:[#allocation19 + $0xf0] sm:$0xff]  }
 0x73d   :  { %1355 = vmatprep.subr.bf16.mxu1 %v2813_v35  ;;  %v2871_v35 = vld [vmem:[#allocation19 + $0xf8] sm:$0xff]  }
 0x740   :  { %1356 = vmatpush1.bf16.msra.mxu1 %v2811_v13  ;;  %v2870_v13 = vld [vmem:[#allocation19 + $0x38] sm:$0xff]  }
 0x741   :  { %1423 = vmatprep.subr.bf16.mxu1 %v2819_v16  ;;  %v3794_v16 = vld [vmem:[%s3879_s12] sm:$0x3f] }
 0x7f6   :  { %v964_v56 = vpop.f32.mrb[16].mxu1 }
 0x7f7   :  { %v965_v57 = vadd.f32 %v964_v56, %v3651_v34  ;;  %v2676_v59 = vpop.f32.mrb[17].mxu1  ;;  %v2784_v34 = vld [vmem:[#allocation18 + $0x68] ss:$24 sps:$4 sm:$0xff]  }
 0x7f8   :  { %v967_v60 = vpop.f32.mrb[18].mxu1  ;;  %v2843_v56 = vld [vmem:[#allocation19 + $0xc0] sm:$0xff]   ;;  %v2848_v59 = vld [vmem:[#allocation19 + $0x88] sm:$0xff]  }
 0x7f9   :  { %v974_v62 = vadd.f32 %v973_v58, %v965_v57  ;;  %v2677_v63 = vpop.f32.mrb[19].mxu1  ;;  %v2844_v57 = vld [vmem:[#allocation19 + $0x80] sm:$0xff]   ;;  %v2847_v58 = vld [vmem:[#allocation19 + $0xc8] sm:$0xff]   ;;  %v2849_v60 = vld [vmem:[#allocation19 + $0x50] sm:$0xff]  }
 0x7fa   :  { %v2851_v63 = vld [vmem:[#allocation19 + $0xd0] sm:$0xff]  }
 0x7fb   :  { %v975_v0 = vadd.f32 %v3664_v45, %v974_v62  ;;  %v2804_v45 = vld [vmem:[#allocation18 + $0xfc] ss:$24 sps:$4 sm:$0xff]  }
 0x7fc   :  { %v2850_v62 = vld [vmem:[#allocation19 + $0x10] sm:$0xff]  }
 0x7fd   :  { %v976_v1 = vmax.f32 %v975_v0, 0.0  ;;  %v2852_v0 = vld [vmem:[#allocation19 + $0x90] sm:$0xff]  }
 0x7ff   :  { %v977_v3 = vpack.c.bf16 %v976_v1, %v976_v1  ;;  %v2853_v1 = vld [vmem:[#allocation19 + $0x58] sm:$0xff]  }
 0x801   :  { %2695 = vmatmul.mubr.bf16.vlgmr.msra.gmra.mrb[20].mxu0 %v977_v3  ;;  %v2855_v3 = vld [vmem:[#allocation19 + $0xd8] sm:$0xff]  }
 0x802   :  { %1383 = vmatpush1.bf16.msra.mxu0 %v2772_v2  ;;  %1414 = vmatprep.mubr.bf16.mxu0 %v3217_v36  ;;  %v2854_v2 = vld [vmem:[#allocation19 + $0x18] sm:$0xff]  }
 0x803   :  { %1384 = vmatprep.subr.bf16.mxu0 %v2780_v4  ;;  %v2856_v4 = vld [vmem:[#allocation19 + $0x98] sm:$0xff]  }
 0x806   :  { %1385 = vmatpush1.bf16.msra.mxu0 %v2778_v5  ;;  %v2857_v5 = vld [vmem:[#allocation19 + $0x60] sm:$0xff]  }
 0x807   :  { %1386 = vmatprep.subr.bf16.mxu0 %v2786_v7  ;;  %v2858_v7 = vld [vmem:[#allocation19 + $0x20] sm:$0xff]  }
 0x80a   :  { %1387 = vmatpush1.bf16.msra.mxu0 %v2784_v34  ;;  %v2859_v34 = vld [vmem:[#allocation19 + $0xe0] sm:$0xff]  }
 0x80b   :  { %1388 = vmatprep.subr.bf16.mxu0 %v2792_v8  ;;  %v2860_v8 = vld [vmem:[#allocation19 + $0xa0] sm:$0xff]  }
 0x80e   :  { %1389 = vmatpush1.bf16.msra.mxu0 %v2790_v27  ;;  %v2861_v27 = vld [vmem:[#allocation19 + $0x68] sm:$0xff]  }
 0x80f   :  { %1390 = vmatprep.subr.bf16.mxu0 %v2798_v10  ;;  %v2862_v10 = vld [vmem:[#allocation19 + $0x28] sm:$0xff]  }
 0x812   :  { %1391 = vmatpush1.bf16.msra.mxu0 %v2796_v12  ;;  %v2863_v12 = vld [vmem:[#allocation19 + $0xe8] sm:$0xff]  }
 0x813   :  { %1392 = vmatprep.subr.bf16.mxu0 %v2804_v45  ;;  %v2864_v45 = vld [vmem:[#allocation19 + $0xa8] sm:$0xff]  }
 0x816   :  { %1393 = vmatpush1.bf16.msra.mxu0 %v2802_v20  ;;  %v2865_v20 = vld [vmem:[#allocation19 + $0x70] sm:$0xff]  }
 0x817   :  { %1394 = vmatprep.subr.bf16.mxu0 %v2810_v30  ;;  %v2868_v30 = vld [vmem:[#allocation19 + $0xb0] sm:$0xff]  }
 0x81a   :  { %1395 = vmatpush1.bf16.msra.mxu0 %v2808_v31  ;;  %v2869_v31 = vld [vmem:[#allocation19 + $0x78] sm:$0xff]  }
 0x81b   :  { %1396 = vmatprep.subr.bf16.mxu0 %v2816_v14  ;;  %v2872_v14 = vld [vmem:[#allocation19 + $0xb8] sm:$0xff]  }
 0x81e   :  { %1397 = vmatpush1.bf16.msra.mxu0 %v2814_v15  ;;  %v2873_v15 = vld [vmem:[#allocation19 + $0x140] sm:$0xff]  }
 0x81f   :  { %2397 = vmatprep.subr.bf16.mxu0 %v2841_v17  ;;  %v1082_v17 = vrot.slane %v3794_v16, %v3754_v11 }
 0x8d4   :  { %v1012_v37 = vpop.f32.mrb[20].mxu0 }
 0x8d5   :  { %v1013_v38 = vadd.f32 %v3688_v52, %v1012_v37  ;;  %v2696_v18 = vpop.f32.mrb[21].mxu0  ;;  %v2846_v52 = vld [vmem:[#allocation19 + $0x8] sm:$0xff]   ;;  %v1078_v37 = vrot.slane %v3794_v16, %v3711_v61 }
 0x8d6   :  { %v1015_v41 = vpop.f32.mrb[22].mxu0 }
 0x8d7   :  { %v1018_v19 = vmul.f32 0.25, %v1013_v38  ;;  %v2697_v22 = vpop.f32.mrb[23].mxu0  ;;  %v1086_v38 = vrot.slane %v3794_v16, %v3783_v55 }
 0x8d9   :  { %v1019_v23 = vsub.f32 %v3778_v26, %v1018_v19  ;;  %v2826_v26 = vld [vmem:[#allocation18 + $0xa0] ss:$24 sps:$4 sm:$0xff]  }
 0x8db   :  { %v1020_v25 = vpack.c.bf16 %v1019_v23, %v1019_v23 }
 0x8dd   :  { %1374 = vmatmul.mubr.bf16.vlgmr.msra.gmra.mrb[20].mxu1 %v1020_v25  ;;  %1415 = vmatmul.mubr.bf16.vlgmr.msra.gmra.mrb[24].mxu0 %v1020_v25 }
 0x8de   :  { %1424 = vmatpush1.bf16.msra.mxu1 %v2817_v24  ;;  %1455 = vmatprep.mubr.bf16.mxu1 %v3217_v36  ;;  %v1074_v36 = vrot.slane %v3794_v16, %v3656_v40 }
 0x8df   :  { %1425 = vmatprep.subr.bf16.mxu1 %v2822_v42  ;;  %2398 = vmatpush3.bf16.msra.mxu0 %v2842_v29 }
 0x8e0   :  { %2399 = vmatprep.subr.bf16.mxu0 %v2845_v43 }
 0x8e2   :  { %1426 = vmatpush1.bf16.msra.mxu1 %v2820_v44 }
 0x8e3   :  { %1427 = vmatprep.subr.bf16.mxu1 %v2825_v32  ;;  %2400 = vmatpush3.bf16.msra.mxu0 %v2846_v52  ;;  %v3807_v52 = vld [vmem:[%s3880_s13] sm:$0x3f] }
 0x8e4   :  { %2401 = vmatprep.subr.bf16.mxu0 %v2849_v60 }
 0x8e6   :  { %1428 = vmatpush1.bf16.msra.mxu1 %v2823_v46  ;;  %v3812_v46 = vld [vmem:[%s3881_s14] sm:$0x3f] }
 0x8e7   :  { %1429 = vmatprep.subr.bf16.mxu1 %v2828_v6  ;;  %2402 = vmatpush3.bf16.msra.mxu0 %v2850_v62  ;;  %v1481_v6 = vrot.slane %v3807_v52, %v3656_v40 }
 0x8e8   :  { %2403 = vmatprep.subr.bf16.mxu0 %v2853_v1 }
 0x8ea   :  { %1430 = vmatpush1.bf16.msra.mxu1 %v2826_v26  ;;  %v1489_v26 = vrot.slane %v3807_v52, %v3754_v11 }
 0x8eb   :  { %1431 = vmatprep.subr.bf16.mxu1 %v2831_v33  ;;  %2404 = vmatpush3.bf16.msra.mxu0 %v2854_v2  ;;  %v1485_v33 = vrot.slane %v3807_v52, %v3711_v61 }
 0x8ec   :  { %2405 = vmatprep.subr.bf16.mxu0 %v2857_v5 }
 0x8ee   :  { %1432 = vmatpush1.bf16.msra.mxu1 %v2829_v47  ;;  %v1519_v47 = vrot.slane %v3812_v46, %v3656_v40 }
 0x8ef   :  { %1433 = vmatprep.subr.bf16.mxu1 %v2834_v48  ;;  %2406 = vmatpush3.bf16.msra.mxu0 %v2858_v7 }
 0x8f0   :  { %2407 = vmatprep.subr.bf16.mxu0 %v2861_v27 }
 0x8f2   :  { %1434 = vmatpush1.bf16.msra.mxu1 %v2832_v49  ;;  %v1493_v49 = vrot.slane %v3807_v52, %v3783_v55 }
 0x8f3   :  { %1435 = vmatprep.subr.bf16.mxu1 %v2837_v50  ;;  %2408 = vmatpush3.bf16.msra.mxu0 %v2862_v10  ;;  %v1527_v50 = vrot.slane %v3812_v46, %v3754_v11 }
 0x8f4   :  { %2409 = vmatprep.subr.bf16.mxu0 %v2865_v20 }
 0x8f6   :  { %1436 = vmatpush1.bf16.msra.mxu1 %v2835_v51 }
 0x8f7   :  { %1437 = vmatprep.subr.bf16.mxu1 %v2840_v53  ;;  %2410 = vmatpush3.bf16.msra.mxu0 %v2866_v21  ;;  %v1523_v53 = vrot.slane %v3812_v46, %v3711_v61  ;;  %v1093_v21 = vsub.s32 5, %v3653_v39 }
 0x8f8   :  { %2411 = vmatprep.subr.bf16.mxu0 %v2869_v31  ;;  %v2877_v31 = vld [vmem:[#allocation19 + $0x150] sm:$0xff]  }
 0x8fa   :  { %1438 = vmatpush1.bf16.msra.mxu1 %v2838_v54 }
 0x8fb   :  { %2419 = vmatprep.subr.bf16.mxu1 %v2843_v56  ;;  %2412 = vmatpush3.bf16.msra.mxu0 %v2870_v13 }
 0x8fc   :  { %2441 = vmatprep.subr.bf16.mxu0 %v2873_v15 }
 0x8fd   :  { %1456 = vmatmul.mubr.bf16.vlgmr.msra.gmra.mrb[24].mxu1 %v1020_v25 }
 0x8fe   :  { %2420 = vmatpush3.bf16.msra.mxu1 %v2844_v57  ;;  %v1531_v57 = vrot.slane %v3812_v46, %v3783_v55  ;;  %v2874_v55 = vld [vmem:[#allocation19 + $0x100] sm:$0xff]  }
 0x8ff   :  { %2421 = vmatprep.subr.bf16.mxu1 %v2847_v58 }
 0x902   :  { %2422 = vmatpush3.bf16.msra.mxu1 %v2848_v59 }
 0x903   :  { %2423 = vmatprep.subr.bf16.mxu1 %v2851_v63 }
 0x906   :  { %2424 = vmatpush3.bf16.msra.mxu1 %v2852_v0 }
 0x907   :  { %2425 = vmatprep.subr.bf16.mxu1 %v2855_v3 }
 0x90a   :  { %2426 = vmatpush3.bf16.msra.mxu1 %v2856_v4 }
 0x90b   :  { %2427 = vmatprep.subr.bf16.mxu1 %v2859_v34 }
 0x90e   :  { %2428 = vmatpush3.bf16.msra.mxu1 %v2860_v8 }
 0x90f   :  { %2429 = vmatprep.subr.bf16.mxu1 %v2863_v12  ;;  %v2875_v12 = vld [vmem:[#allocation19 + $0x148] sm:$0xff]  }
 0x912   :  { %2430 = vmatpush3.bf16.msra.mxu1 %v2864_v45  ;;  %v1089_v45 = vsub.s32 4, %v3653_v39 }
 0x913   :  { %2431 = vmatprep.subr.bf16.mxu1 %v2867_v28  ;;  %v2876_v28 = vld [vmem:[#allocation19 + $0x108] sm:$0xff]  }
 0x916   :  { %2432 = vmatpush3.bf16.msra.mxu1 %v2868_v30  ;;  %v1090_v30 = vrot.slane %v3794_v16, %v1089_v45 }
 0x917   :  { %2433 = vmatprep.subr.bf16.mxu1 %v2871_v35  ;;  %v1094_v35 = vrot.slane %v3794_v16, %v1093_v21  ;;  %v2883_v16 = vld [vmem:[#allocation19 + $0x168] sm:$0xff]  }
 0x91a   :  { %2434 = vmatpush3.bf16.msra.mxu1 %v2872_v14  ;;  %v2878_v14 = vld [vmem:[#allocation19 + $0x110] sm:$0xff]  }
 0x9b0   :  { %v1375_v18 = vpop.f32.mrb[20].mxu1  ;;  %v1416_v41 = vpop.f32.mrb[24].mxu0 }
 0x9b1   :  { %v1376_v19 = vadd.f32 %v1375_v18, %v1074_v36  ;;  %v1417_v22 = vadd.f32 %v1416_v41, %v1082_v17  ;;  %v1377_v23 = vpop.f32.mrb[21].mxu1  ;;  %v1418_v24 = vpop.f32.mrb[25].mxu0  ;;  %v2879_v17 = vld [vmem:[#allocation19 + $0x158] sm:$0xff]   ;;  %v2881_v41 = vld [vmem:[#allocation19 + $0x160] sm:$0xff]  }
 0x9b2   :  { %v1378_v25 = vadd.f32 %v1377_v23, %v1078_v37  ;;  %v1419_v42 = vadd.f32 %v1418_v24, %v1086_v38  ;;  %v1379_v29 = vpop.f32.mrb[22].mxu1  ;;  %v1420_v43 = vpop.f32.mrb[26].mxu0  ;;  %v2880_v18 = vld [vmem:[#allocation19 + $0x118] sm:$0xff]   ;;  %v1501_v23 = vrot.slane %v3807_v52, %v1093_v21  ;;  %v2884_v24 = vld [vmem:[#allocation19 + $0x128] sm:$0xff]  }
 0x9b3   :  { %2889 = vtanh.f32 %v1376_v19  ;;  %v1380_v44 = vpop.f32.mrb[23].mxu1  ;;  %v1421_v32 = vpop.f32.mrb[27].mxu0  ;;  %v2882_v19 = vld [vmem:[#allocation19 + $0x120] sm:$0xff]   ;;  %v2885_v29 = vld [vmem:[#allocation19 + $0x170] sm:$0xff]   ;;  %v1539_v43 = vrot.slane %v3812_v46, %v1093_v21 }
 0x9b4   :  { %2891 = vtanh.f32 %v1417_v22  ;;  %v1497_v22 = vrot.slane %v3807_v52, %v1089_v45 }
 0x9b5   :  { %2893 = vtanh.f32 %v1378_v25  ;;  %v1535_v25 = vrot.slane %v3812_v46, %v1089_v45 }
 0x9b6   :  { %2895 = vtanh.f32 %v1419_v42 }
 0x9bd   :  { %v2890_v48 = vpop.eup %2889 }
 0x9be   :  { %v2892_v51 = vpop.eup %2891  ;;  %1470 = vst [vmem:[#allocation21] sm:$0xff] %v2890_v48  ;;  %v1508_v54 = vmul.f32 %v2890_v48, %v1481_v6 }
 0x9bf   :  { %v2894_v56 = vpop.eup %2893  ;;  %1472 = vst [vmem:[#allocation21 + $0x10] sm:$0xff] %v2892_v51  ;;  %v1510_v58 = vmul.f32 %v2892_v51, %v1489_v26  ;;  %v2886_v26 = vld [vmem:[#allocation19 + $0x130] sm:$0xff]  }
 0x9c0   :  { %v2896_v40 = vpop.eup %2895  ;;  %1471 = vst [vmem:[#allocation21 + $0x8] sm:$0xff] %v2894_v56  ;;  %v1509_v59 = vmul.f32 %v2894_v56, %v1485_v33  ;;  %v1546_v60 = vadd.f32 %v1519_v47, %v1508_v54  ;;  %v2887_v47 = vld [vmem:[#allocation19 + $0x178] sm:$0xff]  }
 0x9c1   :  { %1473 = vst [vmem:[#allocation21 + $0x18] sm:$0xff] %v2896_v40  ;;  %v1511_v62 = vmul.f32 %v2896_v40, %v1493_v49  ;;  %v1548_v63 = vadd.f32 %v1527_v50, %v1510_v58  ;;  %v2888_v50 = vld [vmem:[#allocation19 + $0x138] sm:$0xff]  }
 0x9c2   :  { %v1547_v11 = vadd.f32 %v1523_v53, %v1509_v59  ;;  %v1552_v0 = vmax.f32 %v1546_v60, 0.0  ;;  %v2241_v58 = vld [vmem:[%s3883_s16] ss:$0 sm:$0xff]  ;;  %s3218_s16 = smov [#allocation21]  }
 0x9c3   :  { %v1549_v1 = vadd.f32 %v1531_v57, %v1511_v62  ;;  %v1554_v2 = vmax.f32 %v1548_v63, 0.0  ;;  %s2103_s25 = sshll.u32 %s3218_s16, 4  ;;  %s2104_s25 = int_to_ptr.vmem [resolvable:$true] %s2103_s25 }
 0x9c4   :  { %v1553_v3 = vmax.f32 %v1547_v11, 0.0  ;;  %v1558_v4 = vmin.f32 %v1552_v0, 1.0  ;;  %s3135_s2 = scalar_lea.vmem %s2104_s25, 768  ;;  %p3140_p0 = scmp.lt.s32.totalorder %s2104_s25, %s2104_s25 }
 0x9c5   :  { %v1555_v61 = vmax.f32 %v1549_v1, 0.0  ;;  %v1560_v7 = vmin.f32 %v1554_v2, 1.0  ;;  %p3136_p13 = scmp.ne.s32.totalorder %s2104_s25, %s3135_s2  ;;  %p3141_p1 = scmp.lt.s32.totalorder %s3135_s2, %s3135_s2 }
 0x9c6   :  { %v1559_v5 = vmin.f32 %v1553_v3, 1.0  ;;  %v1564_v10 = vpack.c.bf16 %v1558_v4, %v1558_v4 }
 0x9c7   :  { %v1561_v34 = vmin.f32 %v1555_v61, 1.0  ;;  %v1566_v20 = vpack.c.bf16 %v1560_v7, %v1560_v7  ;;  %p3142_p2 = por %p3141_p1, %p3140_p0 }
 0x9c8   :  { %v1565_v8 = vpack.c.bf16 %v1559_v5, %v1559_v5 }
 0x9c9   :  { %v1567_v27 = vpack.c.bf16 %v1561_v34, %v1561_v34  ;;  %p3143_p3 = pnand %p3142_p2, %p3136_p13 }
 0x9ca   :  { %1993 = vmatprep.mubr.bf16.mxu0 %v1565_v8 }
 0x9cb   :  { %2033 = vmatprep.mubr.bf16.mxu1 %v1567_v27  ;;  %1994 = vmatmul.mubr.bf16.vlgmr.msra.gmra.mrb[28].mxu0 %v1564_v10 }
 0x9cc   :  { %2034 = vmatmul.mubr.bf16.vlgmr.msra.gmra.mrb[28].mxu1 %v1566_v20  ;;  %2442 = vmatpush3.bf16.msra.mxu0 %v2874_v55  ;;  %v365_v55 = vsel %vm364_vm2, %v3555_v9, 0.0 }
 0x9cd   :  { %2443 = vmatprep.subr.bf16.mxu0 %v2875_v12  ;;  %v2087_v12 = vmul.f32 %v365_v55, %v365_v55 }
 0x9d0   :  { %2444 = vmatpush3.bf16.msra.mxu0 %v2876_v28  ;;  %v1457_v13 = vpop.f32.mrb[24].mxu1 }
 0x9d1   :  { %v1458_v15 = vadd.f32 %v1457_v13, %v1090_v30  ;;  %v1459_v36 = vpop.f32.mrb[25].mxu1  ;;  %2445 = vmatprep.subr.bf16.mxu0 %v2877_v31 }
 0x9d2   :  { %v1460_v37 = vadd.f32 %v1459_v36, %v1094_v35  ;;  %v1461_v39 = vpop.f32.mrb[26].mxu1 }
 0x9d3   :  { %2897 = vtanh.f32 %v1458_v15  ;;  %v1462_v38 = vpop.f32.mrb[27].mxu1 }
 0x9d4   :  { %2899 = vtanh.f32 %v1460_v37  ;;  %2446 = vmatpush3.bf16.msra.mxu0 %v2878_v14 }
 0x9d5   :  { %2447 = vmatprep.subr.bf16.mxu0 %v2879_v17 }
 0x9d8   :  { %2448 = vmatpush3.bf16.msra.mxu0 %v2880_v18 }
 0x9d9   :  { %2449 = vmatprep.subr.bf16.mxu0 %v2881_v41 }
 0x9dc   :  { %2450 = vmatpush3.bf16.msra.mxu0 %v2882_v19 }
 0x9dd   :  { %v2898_v42 = vpop.eup %2897  ;;  %2451 = vmatprep.subr.bf16.mxu0 %v2883_v16 }
 0x9de   :  { %v2900_v44 = vpop.eup %2899  ;;  %1474 = vst [vmem:[#allocation21 + $0x20] sm:$0xff] %v2898_v42  ;;  %v1512_v32 = vmul.f32 %v2898_v42, %v1497_v22 }
 0x9df   :  { %1475 = vst [vmem:[#allocation21 + $0x28] sm:$0xff] %v2900_v44  ;;  %v1513_v6 = vmul.f32 %v2900_v44, %v1501_v23 }
 0x9e0   :  { %2452 = vmatpush3.bf16.msra.mxu0 %v2884_v24  ;;  %v1550_v33 = vadd.f32 %v1535_v25, %v1512_v32 }
 0x9e1   :  { %2453 = vmatprep.subr.bf16.mxu0 %v2885_v29  ;;  %v1551_v52 = vadd.f32 %v1539_v43, %v1513_v6 }
 0x9e2   :  { %v1556_v48 = vmax.f32 %v1550_v33, 0.0 }
 0x9e3   :  { %v1557_v49 = vmax.f32 %v1551_v52, 0.0 }
 0x9e4   :  { %2454 = vmatpush3.bf16.msra.mxu0 %v2886_v26  ;;  %v1562_v53 = vmin.f32 %v1556_v48, 1.0 }
 0x9e5   :  { %2455 = vmatprep.subr.bf16.mxu0 %v2887_v47  ;;  %v1563_v51 = vmin.f32 %v1557_v49, 1.0 }
 0x9e6   :  { %v1568_v46 = vpack.c.bf16 %v1562_v53, %v1562_v53 }
 0x9e7   :  { %v1569_v54 = vpack.c.bf16 %v1563_v51, %v1563_v51 }
 0x9e8   :  { %2456 = vmatpush3.bf16.msra.mxu0 %v2888_v50 }
 0x9e9   :  { %2073 = vmatprep.mubr.bf16.mxu0 %v1569_v54 }
 0x9eb   :  { %2074 = vmatmul.mubr.bf16.vlgmr.msra.gmra.mrb[32].mxu0 %v1568_v46 }
 0xa9e   :  { %v2413_v56 = vpop.f32.mrb[28].mxu0 }
 0xa9f   :  { %v2435_v57 = vpop.f32.mrb[28].mxu1  ;;  %v2414_v40 = vpop.f32.mrb[29].mxu0 }
 0xaa0   :  { %v2415_v59 = vadd.f32 %v2414_v40, %v2413_v56  ;;  %v2436_v60 = vpop.f32.mrb[29].mxu1  ;;  %v2416_v62 = vpop.f32.mrb[30].mxu0 }
 0xaa1   :  { %v2437_v63 = vadd.f32 %v2436_v60, %v2435_v57  ;;  %v2438_v11 = vpop.f32.mrb[30].mxu1  ;;  %v2417_v0 = vpop.f32.mrb[31].mxu0 }
 0xaa2   :  { %v1996_v1 = vadd.f32 %v2415_v59, %v2241_v58  ;;  %v2439_v2 = vpop.f32.mrb[31].mxu1 }
 0xaa4   :  { %v2036_v3 = vadd.f32 %v2437_v63, %v1996_v1 }
 0xabe   :  { %v2457_v61 = vpop.f32.mrb[32].mxu0 }
 0xabf   :  { %v2458_v4 = vpop.f32.mrb[33].mxu0 }
 0xac0   :  { %v2459_v5 = vadd.f32 %v2458_v4, %v2457_v61  ;;  %v2460_v7 = vpop.f32.mrb[34].mxu0 }
 0xac1   :  { %v2461_v34 = vpop.f32.mrb[35].mxu0 }
 0xac2   :  { %v2076_v8 = vadd.f32 %v2459_v5, %v2036_v3 }
 0xac4   :  { %v2084_v27 = vmul.f32 %v2076_v8, %v2076_v8  ;;  %v2081_v10 = vmul.f32 %v2076_v8, %v365_v55 }
 0xac6   :  { %2085 = vadd.xlane.f32.xlu0 %v2084_v27  ;;  %2082 = vadd.xlane.f32.xlu1 %v2081_v10 }
 0xaca   :  { %2088 = vadd.xlane.f32.xlu0 %v2087_v12 }
 0xacb   :  { %3146 = shalt.err (!%p3143_p3)
}
 0xacc   :  { %s3902_s0 = sld [smem:[#allocation36_spill]] }
 0xad2   :  { %s3147_s17 = scalar_lea.hbm %s3902_s0, 768 }
 0xad3   :  { %p3148_p4 = scmp.ne.s32.totalorder %s3902_s0, %s3147_s17  ;;  %p3151_p5 = scmp.lt.u32.totalorder %s3147_s17, %s3902_s0 }
 0xad5   :  { %p3153_p6 = pnand %p3151_p5, %p3148_p4 }
 0xad7   :  { %3156 = shalt.err (!%p3153_p6)
}
 0xad8   :  { %2106 = dma.vmem_to_hbm [thread:$0]  %s2104_s25, 768, %s3902_s0, [#allocation4]  }
 0xad9   :  { %s3219_s29 = smov [#allocation22]  }
 0xada   :  { %s2113_s5 = sshll.u32 %s3219_s29, 4  ;;  %s2114_s5 = int_to_ptr.vmem [resolvable:$true] %s2113_s5 }
 0xadb   :  { %s3157_s9 = scalar_lea.vmem %s2114_s5, 128  ;;  %p3162_p8 = scmp.lt.s32.totalorder %s2114_s5, %s2114_s5 }
 0xadc   :  { %p3158_p7 = scmp.ne.s32.totalorder %s2114_s5, %s3157_s9  ;;  %p3163_p9 = scmp.lt.s32.totalorder %s3157_s9, %s3157_s9 }
 0xade   :  { %p3164_p10 = por %p3163_p9, %p3162_p8 }
 0xae0   :  { %p3165_p11 = pnand %p3164_p10, %p3158_p7 }
 0xb53   :  { %v2086_v9 = vpop.xlane.xlu0 %2085  ;;  %v2083_v30 = vpop.xlane.xlu1 %2082 }
 0xb54   :  { %v2090_v45 = vmax.f32 %v2086_v9, 1e-16 }
 0xb56   :  { %2901 = vrsqrt.f32 %v2090_v45 }
 0xb57   :  { %v2089_v20 = vpop.xlane.xlu0 %2088 }
 0xb58   :  { %v2093_v21 = vmax.f32 %v2089_v20, 1e-16 }
 0xb5a   :  { %2903 = vrsqrt.f32 %v2093_v21 }
 0xb60   :  { %v2902_v28 = vpop.eup %2901 }
 0xb61   :  { %v2092_v31 = vmul.f32 %v2902_v28, %v2083_v30 }
 0xb64   :  { %v2904_v35 = vpop.eup %2903 }
 0xb65   :  { %v2095_v13 = vmul.f32 %v2904_v35, %v2092_v31 }
 0xb67   :  { %2096 = vst [vmem:[#allocation22] sm:$0xff] %v2095_v13 }
 0xb68   :  { %3168 = shalt.err (!%p3165_p11)
}
 0xb69   :  { %s3903_s23 = sld [smem:[#allocation37_spill]] }
 0xb6f   :  { %s3169_s24 = scalar_lea.hbm %s3903_s23, 128 }
 0xb70   :  { %p3170_p12 = scmp.ne.s32.totalorder %s3903_s23, %s3169_s24  ;;  %p3173_p13 = scmp.lt.u32.totalorder %s3169_s24, %s3903_s23 }
 0xb72   :  { %p3175_p0 = pnand %p3173_p13, %p3170_p12 }
 0xb74   :  { %3178 = shalt.err (!%p3175_p0)
}
 0xb75   :  { %2116 = dma.vmem_to_hbm [thread:$0]  %s2114_s5, 128, %s3903_s23, [#allocation23]  }
 0xb76   :  { %3193 = dma.done.wait [#allocation4], 768  }
 0xb77   :  { %3194 = vsyncadd [#allocation4], 4294966528 }
 0xb78   :  { %3195 = dma.done.wait [#allocation23], 128  }
 0xb79   :  { %3196 = vsyncadd [#allocation23], 4294967168 }
 0xb7a   :  { %2123 = vsyncpa [#allocation3], 1 }
 0xb7b   :  { %2124 = vsyncpa [#allocation8], 1 }
 0xb7c   :  { %2125 = vsyncpa [#allocation11], 1 }
 0xb7d   :  { %2126 = vsyncpa [#allocation14], 1 }
 0xb7e   :  { %2127 = vsyncpa [#allocation17], 1 }
 0xb7f   :  { %2128 = vsyncpa [#allocation20], 1 }
 0xb80   :  { %2129 = vsyncpa [#allocation4], 1 }
 0xb81   :  { %2130 = vsyncpa [#allocation23], 1 }
 0xb82   :  { %2131 = vsyncpa [#allocation5], 1 }

</bundles_post_ra>
